<compile_context>
chip_gen: v5e
topology: v5e:2x2
jax: 0.10.0
libtpu: 0.0.40
codegen_flags: <defaults>
</compile_context>

<pallas_src>
import jax
import jax.numpy as jnp
import numpy as np
from jax import lax
from jax.experimental import pallas as pl
from jax.experimental.pallas import tpu as pltpu


def _make_plan_map_bound_kernel(map_thresh, dis_thresh, pc_range):
    x_scale = float(pc_range[3] - pc_range[0])
    x_off = float(pc_range[0])
    y_scale = float(pc_range[4] - pc_range[1])
    y_off = float(pc_range[1])
    map_thresh = float(map_thresh)
    dis_thresh = float(dis_thresh)

    def kernel(ego_ref, lane_ref, bscore_ref, loss_ref):
        f32 = jnp.float32
        ego_x = ego_ref[0]                         # [B, T] per-step x offsets
        ego_y = ego_ref[1]                         # [B, T] per-step y offsets
        B, T = ego_x.shape
        _, P, _, Vp = lane_ref.shape               # lanes: [2, P, B, Vp]

        # --- denormalize lane points + mask non-boundary instances -----------
        not_bound = (bscore_ref[...] < map_thresh)[None, :, :]        # [1,B,Vp]
        lx = jnp.where(not_bound, 1e6, lane_ref[0] * x_scale + x_off)  # [P,B,Vp]
        ly = jnp.where(not_bound, 1e6, lane_ref[1] * y_scale + y_off)  # [P,B,Vp]

        # --- ego trajectory: inclusive cumsum via triangular mask; exclusive
        #     cumsum derived as px - ego_x (no second masked reduce) ----------
        t_row = lax.broadcasted_iota(jnp.int32, (T, T), 0)             # t
        t_col = lax.broadcasted_iota(jnp.int32, (T, T), 1)             # t'
        tri_incl = (t_col <= t_row).astype(f32)                        # t' <= t
        px = jnp.sum(tri_incl[None] * ego_x[:, None, :], axis=-1)      # [B, T]
        py = jnp.sum(tri_incl[None] * ego_y[:, None, :], axis=-1)
        sx = px - ego_x                                                # starts
        sy = py - ego_y

        # hoisted broadcasts (reused across the unrolled P loops)
        pxb = px[:, :, None]                       # [B, T, 1] segment ends
        pyb = py[:, :, None]
        sxb = sx[:, :, None]                       # [B, T, 1] segment starts
        syb = sy[:, :, None]
        dx1 = ego_x[:, :, None]                    # ego segment deltas
        dy1 = ego_y[:, :, None]

        # --- squared point distances: accumulate min over P (VPU only) -------
        dist2_v = jnp.full((B, T, Vp), 1e30, f32)                      # [B,T,Vp]
        for p in range(P):
            dxp = pxb - lx[p][:, None, :]
            dyp = pyb - ly[p][:, None, :]
            dist2_v = jnp.minimum(dist2_v, dxp * dxp + dyp * dyp)

        # --- segment intersection (division-free), any over P-1 segments -----
        inter_any = jnp.zeros((B, T, Vp), f32)                         # [B,T,Vp]
        for p in range(P - 1):
            bsx = lx[p][:, None, :]
            bsy = ly[p][:, None, :]
            dx2 = lx[p + 1][:, None, :] - bsx
            dy2 = ly[p + 1][:, None, :] - bsy
            det = dx1 * dy2 - dx2 * dy1
            rx = bsx - sxb
            ry = bsy - syb
            num1 = rx * dy2 - ry * dx2
            num2 = rx * dy1 - ry * dx1
            adet = jnp.abs(det)
            # 0 <= num/det <= 1  <=>  num*det >= 0  and  |num| <= |det|
            hit = ((det != 0.0)
                   & (num1 * det >= 0.0) & (jnp.abs(num1) <= adet)
                   & (num2 * det >= 0.0) & (jnp.abs(num2) <= adet))
            inter_any = jnp.maximum(inter_any, hit.astype(f32))

        # --- argmin instance over V (first-index tie-break) as one-hot -------
        dmin2 = jnp.min(dist2_v, axis=-1, keepdims=True)               # [B,T,1]
        v_iota = lax.broadcasted_iota(jnp.int32, (B, T, Vp), 2)
        cand = jnp.where(dist2_v == dmin2, v_iota, jnp.int32(Vp))
        arg_v = jnp.min(cand, axis=-1, keepdims=True)                  # [B,T,1]
        onehot = (v_iota == arg_v).astype(f32)                         # [B,T,Vp]
        inter_t = jnp.max(inter_any * onehot, axis=-1)                 # [B, T]

        # temporal zero-out "loss[b, t:] = 0" -> cumulative max over t' <= t
        inter_cum = jnp.max(inter_t[:, None, :] * tri_incl[None], axis=-1)

        # --- distance-threshold loss (single sqrt on the [B,T] minimum) ------
        min_dist = jnp.sqrt(dmin2[..., 0] + 1e-12)                     # [B, T]
        base = jnp.where(min_dist > dis_thresh, 0.0, dis_thresh - min_dist)
        loss = jnp.where(inter_cum > 0.5, 0.0, base)
        loss_ref[...] = loss.astype(loss_ref.dtype)

    return kernel


def plan_map_bound_loss_per_ts(ego_fut_preds, lane_preds, lane_score_preds, *,
                               map_thresh=0.5, lane_bound_cls_idx=2,
                               dis_thresh=1.0,
                               pc_range=(-15.0, -30.0, -2.0, 15.0, 30.0, 2.0)):
    """Returns the un-weighted per-timestep loss [B, fut_ts] (Pallas kernel)."""
    ego = jnp.asarray(ego_fut_preds, jnp.float32)       # [B, T, 2]
    lane = jnp.asarray(lane_preds, jnp.float32)         # [B, V, P, 2]
    score = jnp.asarray(lane_score_preds, jnp.float32)  # [B, V, C]
    B, T, _ = ego.shape
    _, V, P, _ = lane.shape
    Vp = ((V + 127) // 128) * 128                       # V on the 128-lane axis

    # --- layout plumbing (wrapper side only) ---
    ego_packed = jnp.stack([ego[..., 0], ego[..., 1]], axis=0)   # [2, B, T]
    lane_packed = jnp.transpose(lane, (3, 2, 0, 1))              # [2, P, B, V]
    bscore = score[..., lane_bound_cls_idx]                      # [B, V]
    if Vp != V:
        lane_packed = jnp.pad(lane_packed,
                              ((0, 0), (0, 0), (0, 0), (0, Vp - V)))
        # pad scores with a very negative value so padded lanes are masked out
        bscore = jnp.pad(bscore, ((0, 0), (0, Vp - V)),
                         constant_values=-1e30)

    kernel = _make_plan_map_bound_kernel(map_thresh, dis_thresh, tuple(pc_range))
    vmem = pltpu.MemorySpace.VMEM
    return pl.pallas_call(
        kernel,
        out_shape=jax.ShapeDtypeStruct((B, T), jnp.float32),
        in_specs=[pl.BlockSpec(memory_space=vmem)] * 3,
        out_specs=pl.BlockSpec(memory_space=vmem),
    )(ego_packed, lane_packed, bscore)


class PlanMapBoundLoss:
    """JAX/Pallas port of VAD's PlanMapBoundLoss (no learnable parameters)."""

    def __init__(self, reduction='mean', loss_weight=1.0, map_thresh=0.5,
                 lane_bound_cls_idx=2, dis_thresh=1.0,
                 point_cloud_range=(-15.0, -30.0, -2.0, 15.0, 30.0, 2.0),
                 perception_detach=False):
        self.reduction = reduction
        self.loss_weight = loss_weight
        self.map_thresh = map_thresh
        self.lane_bound_cls_idx = lane_bound_cls_idx
        self.dis_thresh = dis_thresh
        self.pc_range = tuple(point_cloud_range)
        self.perception_detach = perception_detach

    def __call__(self, ego_fut_preds, lane_preds, lane_score_preds,
                 weight=None, avg_factor=None, reduction_override=None):
        assert reduction_override in (None, 'none', 'mean', 'sum')
        reduction = reduction_override if reduction_override else self.reduction
        if self.perception_detach:
            lane_preds = lax.stop_gradient(lane_preds)
            lane_score_preds = lax.stop_gradient(lane_score_preds)

        loss = plan_map_bound_loss_per_ts(
            ego_fut_preds, lane_preds, lane_score_preds,
            map_thresh=self.map_thresh,
            lane_bound_cls_idx=self.lane_bound_cls_idx,
            dis_thresh=self.dis_thresh,
            pc_range=self.pc_range)                      # [B, fut_ts]

        # mmdet `weighted_loss` / `weight_reduce_loss` semantics (glue in JAX)
        if weight is not None:
            loss = loss * jnp.asarray(weight, loss.dtype)
        if avg_factor is None:
            if reduction == 'mean':
                loss = jnp.mean(loss)
            elif reduction == 'sum':
                loss = jnp.sum(loss)
        else:
            if reduction == 'mean':
                loss = jnp.sum(loss) / avg_factor
            elif reduction != 'none':
                raise ValueError('avg_factor can not be used with reduction="sum"')
        return self.loss_weight * loss


# ---------------------------------------------------------------------------
# Pure numpy reference (mirrors the PyTorch code 1:1) used for verification.
# ---------------------------------------------------------------------------
def _seg_intersect_np(p1s, p1e, p2s, p2e):
    dx1 = p1e[0] - p1s[0]; dy1 = p1e[1] - p1s[1]
    dx2 = p2e[0] - p2s[0]; dy2 = p2e[1] - p2s[1]
    det = dx1 * dy2 - dx2 * dy1
    if det == 0:
        return False
    t1 = ((p2s[0] - p1s[0]) * dy2 - (p2s[1] - p1s[1]) * dx2) / det
    t2 = ((p2s[0] - p1s[0]) * dy1 - (p2s[1] - p1s[1]) * dx1) / det
    return (0.0 <= t1 <= 1.0) and (0.0 <= t2 <= 1.0)


def _reference_per_ts(ego, lane, score, map_thresh, cls_idx, dis_thresh, pc_range):
    ego = np.asarray(ego, np.float32)
    lane = np.asarray(lane, np.float32).copy()
    score = np.asarray(score, np.float32)
    B, T, _ = ego.shape
    _, V, P, _ = lane.shape
    not_bound = score[..., cls_idx] < map_thresh
    lane[..., 0] = lane[..., 0] * (pc_range[3] - pc_range[0]) + pc_range[0]
    lane[..., 1] = lane[..., 1] * (pc_range[4] - pc_range[1]) + pc_range[1]
    lane[not_bound] = 1e6
    pred = np.cumsum(ego, axis=1)
    starts = np.concatenate([np.zeros((B, 1, 2), np.float32), pred[:, :-1]], axis=1)
    dist = np.linalg.norm(pred[:, :, None, None, :] - lane[:, None, :, :, :], axis=-1)
    dist_v = dist.min(axis=-1)                      # [B, T, V]
    arg_v = dist_v.argmin(axis=-1)                  # [B, T]
    out = np.zeros((B, T), np.float32)
    for b in range(B):
        intersected = False
        for t in range(T):
            inst = lane[b, arg_v[b, t]]
            hit = any(_seg_intersect_np(starts[b, t], pred[b, t], inst[p], inst[p + 1])
                      for p in range(P - 1))
            intersected = intersected or hit
            md = dist[b, t].min()
            val = 0.0 if md > dis_thresh else dis_thresh - md
            out[b, t] = 0.0 if intersected else val
    return out


if __name__ == "__main__":
    key = jax.random.PRNGKey(0)
    k1, k2, k3, k4 = jax.random.split(key, 4)
    B, T, V, P = 2, 6, 8, 10   # batch, fut_ts, num_vec, num_pts

    ego_fut_preds = jax.random.normal(k1, (B, T, 2), jnp.float32) * 2.0
    lane_preds = jax.random.uniform(k2, (B, V, P, 2), jnp.float32)   # normalized coords
    lane_score_preds = jax.random.uniform(k3, (B, V, 3), jnp.float32)
    weight = jax.random.uniform(k4, (B, T), jnp.float32)

    loss_mod = PlanMapBoundLoss(reduction='mean', loss_weight=1.0)

    per_ts = plan_map_bound_loss_per_ts(ego_fut_preds, lane_preds, lane_score_preds)
    final = loss_mod(ego_fut_preds, lane_preds, lane_score_preds, weight=weight)
    jax.block_until_ready(per_ts)
    jax.block_until_ready(final)

    ref = _reference_per_ts(ego_fut_preds, lane_preds, lane_score_preds,
                            map_thresh=0.5, cls_idx=2, dis_thresh=1.0,
                            pc_range=(-15.0, -30.0, -2.0, 15.0, 30.0, 2.0))
    np.testing.assert_allclose(np.asarray(per_ts), ref, rtol=1e-4, atol=1e-4)
    assert np.isfinite(np.asarray(final)).all()

    print("KERNEL_OK")
</pallas_src>

<mosaic_0001>
module attributes {stable_mosaic.version = 11 : i64} {
  func.func @kernel(%arg0: memref<2x2x6xf32, #tpu.memory_space<vmem>>, %arg1: memref<2x10x2x128xf32, #tpu.memory_space<vmem>>, %arg2: memref<2x128xf32, #tpu.memory_space<vmem>>, %arg3: memref<2x6xf32, #tpu.memory_space<vmem>>) attributes {dimension_semantics = [], scalar_prefetch = 0 : i64, scratch_operands = 0 : i64, tpu.core_type = #tpu.core_type<tc>} {
    %c0 = arith.constant 0 : index
    %c0_0 = arith.constant 0 : index
    %c0_1 = arith.constant 0 : index
    %0 = vector.load %arg0[%c0, %c0_0, %c0_1] : memref<2x2x6xf32, #tpu.memory_space<vmem>>, vector<1x2x6xf32>
    %1 = vector.shape_cast %0 : vector<1x2x6xf32> to vector<2x6xf32>
    %c1 = arith.constant 1 : index
    %c0_2 = arith.constant 0 : index
    %c0_3 = arith.constant 0 : index
    %2 = vector.load %arg0[%c1, %c0_2, %c0_3] : memref<2x2x6xf32, #tpu.memory_space<vmem>>, vector<1x2x6xf32>
    %3 = vector.shape_cast %2 : vector<1x2x6xf32> to vector<2x6xf32>
    %c0_4 = arith.constant 0 : index
    %c0_5 = arith.constant 0 : index
    %4 = vector.load %arg2[%c0_4, %c0_5] : memref<2x128xf32, #tpu.memory_space<vmem>>, vector<2x128xf32>
    %cst = arith.constant 5.000000e-01 : f32
    %5 = vector.broadcast %cst : f32 to vector<2x128xf32>
    %6 = arith.cmpf olt, %4, %5 : vector<2x128xf32>
    %7 = vector.shape_cast %6 : vector<2x128xi1> to vector<1x2x128xi1>
    %c0_6 = arith.constant 0 : index
    %c0_7 = arith.constant 0 : index
    %c0_8 = arith.constant 0 : index
    %c0_9 = arith.constant 0 : index
    %8 = vector.load %arg1[%c0_6, %c0_7, %c0_8, %c0_9] : memref<2x10x2x128xf32, #tpu.memory_space<vmem>>, vector<1x10x2x128xf32>
    %9 = vector.shape_cast %8 : vector<1x10x2x128xf32> to vector<10x2x128xf32>
    %cst_10 = arith.constant 3.000000e+01 : f32
    %10 = vector.broadcast %cst_10 : f32 to vector<10x2x128xf32>
    %11 = arith.mulf %9, %10 : vector<10x2x128xf32>
    %cst_11 = arith.constant -1.500000e+01 : f32
    %12 = vector.broadcast %cst_11 : f32 to vector<10x2x128xf32>
    %13 = arith.addf %11, %12 : vector<10x2x128xf32>
    %cst_12 = arith.constant 1.000000e+06 : f32
    %14 = vector.shape_cast %7 : vector<1x2x128xi1> to vector<1x2x128xi1>
    %15 = vector.broadcast %14 : vector<1x2x128xi1> to vector<10x2x128xi1>
    %16 = vector.broadcast %cst_12 : f32 to vector<10x2x128xf32>
    %17 = arith.select %15, %16, %13 : vector<10x2x128xi1>, vector<10x2x128xf32>
    %c1_13 = arith.constant 1 : index
    %c0_14 = arith.constant 0 : index
    %c0_15 = arith.constant 0 : index
    %c0_16 = arith.constant 0 : index
    %18 = vector.load %arg1[%c1_13, %c0_14, %c0_15, %c0_16] : memref<2x10x2x128xf32, #tpu.memory_space<vmem>>, vector<1x10x2x128xf32>
    %19 = vector.shape_cast %18 : vector<1x10x2x128xf32> to vector<10x2x128xf32>
    %cst_17 = arith.constant 6.000000e+01 : f32
    %20 = vector.broadcast %cst_17 : f32 to vector<10x2x128xf32>
    %21 = arith.mulf %19, %20 : vector<10x2x128xf32>
    %cst_18 = arith.constant -3.000000e+01 : f32
    %22 = vector.broadcast %cst_18 : f32 to vector<10x2x128xf32>
    %23 = arith.addf %21, %22 : vector<10x2x128xf32>
    %cst_19 = arith.constant 1.000000e+06 : f32
    %24 = vector.shape_cast %7 : vector<1x2x128xi1> to vector<1x2x128xi1>
    %25 = vector.broadcast %24 : vector<1x2x128xi1> to vector<10x2x128xi1>
    %26 = vector.broadcast %cst_19 : f32 to vector<10x2x128xf32>
    %27 = arith.select %25, %26, %23 : vector<10x2x128xi1>, vector<10x2x128xf32>
    %28 = tpu.iota {dimensions = array<i32: 0>} : vector<6x6xi32>
    %29 = tpu.iota {dimensions = array<i32: 1>} : vector<6x6xi32>
    %30 = arith.cmpi sle, %29, %28 : vector<6x6xi32>
    %31 = arith.extui %30 : vector<6x6xi1> to vector<6x6xi32>
    %32 = arith.sitofp %31 : vector<6x6xi32> to vector<6x6xf32>
    %33 = vector.shape_cast %32 : vector<6x6xf32> to vector<1x6x6xf32>
    %34 = vector.shape_cast %1 : vector<2x6xf32> to vector<2x1x6xf32>
    %35 = vector.broadcast %33 : vector<1x6x6xf32> to vector<2x6x6xf32>
    %36 = vector.broadcast %34 : vector<2x1x6xf32> to vector<2x6x6xf32>
    %37 = arith.mulf %35, %36 : vector<2x6x6xf32>
    %cst_20 = arith.constant dense<0.000000e+00> : vector<2x6xf32>
    %38 = vector.multi_reduction <add>, %37, %cst_20 [2] : vector<2x6x6xf32> to vector<2x6xf32>
    %39 = vector.shape_cast %32 : vector<6x6xf32> to vector<1x6x6xf32>
    %40 = vector.shape_cast %3 : vector<2x6xf32> to vector<2x1x6xf32>
    %41 = vector.broadcast %39 : vector<1x6x6xf32> to vector<2x6x6xf32>
    %42 = vector.broadcast %40 : vector<2x1x6xf32> to vector<2x6x6xf32>
    %43 = arith.mulf %41, %42 : vector<2x6x6xf32>
    %cst_21 = arith.constant dense<0.000000e+00> : vector<2x6xf32>
    %44 = vector.multi_reduction <add>, %43, %cst_21 [2] : vector<2x6x6xf32> to vector<2x6xf32>
    %45 = arith.subf %38, %1 : vector<2x6xf32>
    %46 = arith.subf %44, %3 : vector<2x6xf32>
    %47 = vector.shape_cast %38 : vector<2x6xf32> to vector<2x6x1xf32>
    %48 = vector.shape_cast %44 : vector<2x6xf32> to vector<2x6x1xf32>
    %49 = vector.shape_cast %45 : vector<2x6xf32> to vector<2x6x1xf32>
    %50 = vector.shape_cast %46 : vector<2x6xf32> to vector<2x6x1xf32>
    %51 = vector.shape_cast %1 : vector<2x6xf32> to vector<2x6x1xf32>
    %52 = vector.shape_cast %3 : vector<2x6xf32> to vector<2x6x1xf32>
    %cst_22 = arith.constant 1.000000e+30 : f32
    %53 = vector.broadcast %cst_22 : f32 to vector<2x6x128xf32>
    %54 = vector.extract_strided_slice %17 {offsets = [0, 0, 0], sizes = [1, 2, 128], strides = [1, 1, 1]} : vector<10x2x128xf32> to vector<1x2x128xf32>
    %55 = vector.shape_cast %54 : vector<1x2x128xf32> to vector<2x128xf32>
    %56 = vector.shape_cast %55 : vector<2x128xf32> to vector<2x1x128xf32>
    %57 = vector.broadcast %47 : vector<2x6x1xf32> to vector<2x6x128xf32>
    %58 = vector.broadcast %56 : vector<2x1x128xf32> to vector<2x6x128xf32>
    %59 = arith.subf %57, %58 : vector<2x6x128xf32>
    %60 = vector.extract_strided_slice %27 {offsets = [0, 0, 0], sizes = [1, 2, 128], strides = [1, 1, 1]} : vector<10x2x128xf32> to vector<1x2x128xf32>
    %61 = vector.shape_cast %60 : vector<1x2x128xf32> to vector<2x128xf32>
    %62 = vector.shape_cast %61 : vector<2x128xf32> to vector<2x1x128xf32>
    %63 = vector.broadcast %48 : vector<2x6x1xf32> to vector<2x6x128xf32>
    %64 = vector.broadcast %62 : vector<2x1x128xf32> to vector<2x6x128xf32>
    %65 = arith.subf %63, %64 : vector<2x6x128xf32>
    %66 = arith.mulf %59, %59 : vector<2x6x128xf32>
    %67 = arith.mulf %65, %65 : vector<2x6x128xf32>
    %68 = arith.addf %66, %67 : vector<2x6x128xf32>
    %69 = arith.minimumf %53, %68 : vector<2x6x128xf32>
    %70 = vector.extract_strided_slice %17 {offsets = [1, 0, 0], sizes = [1, 2, 128], strides = [1, 1, 1]} : vector<10x2x128xf32> to vector<1x2x128xf32>
    %71 = vector.shape_cast %70 : vector<1x2x128xf32> to vector<2x128xf32>
    %72 = vector.shape_cast %71 : vector<2x128xf32> to vector<2x1x128xf32>
    %73 = vector.broadcast %47 : vector<2x6x1xf32> to vector<2x6x128xf32>
    %74 = vector.broadcast %72 : vector<2x1x128xf32> to vector<2x6x128xf32>
    %75 = arith.subf %73, %74 : vector<2x6x128xf32>
    %76 = vector.extract_strided_slice %27 {offsets = [1, 0, 0], sizes = [1, 2, 128], strides = [1, 1, 1]} : vector<10x2x128xf32> to vector<1x2x128xf32>
    %77 = vector.shape_cast %76 : vector<1x2x128xf32> to vector<2x128xf32>
    %78 = vector.shape_cast %77 : vector<2x128xf32> to vector<2x1x128xf32>
    %79 = vector.broadcast %48 : vector<2x6x1xf32> to vector<2x6x128xf32>
    %80 = vector.broadcast %78 : vector<2x1x128xf32> to vector<2x6x128xf32>
    %81 = arith.subf %79, %80 : vector<2x6x128xf32>
    %82 = arith.mulf %75, %75 : vector<2x6x128xf32>
    %83 = arith.mulf %81, %81 : vector<2x6x128xf32>
    %84 = arith.addf %82, %83 : vector<2x6x128xf32>
    %85 = arith.minimumf %69, %84 : vector<2x6x128xf32>
    %86 = vector.extract_strided_slice %17 {offsets = [2, 0, 0], sizes = [1, 2, 128], strides = [1, 1, 1]} : vector<10x2x128xf32> to vector<1x2x128xf32>
    %87 = vector.shape_cast %86 : vector<1x2x128xf32> to vector<2x128xf32>
    %88 = vector.shape_cast %87 : vector<2x128xf32> to vector<2x1x128xf32>
    %89 = vector.broadcast %47 : vector<2x6x1xf32> to vector<2x6x128xf32>
    %90 = vector.broadcast %88 : vector<2x1x128xf32> to vector<2x6x128xf32>
    %91 = arith.subf %89, %90 : vector<2x6x128xf32>
    %92 = vector.extract_strided_slice %27 {offsets = [2, 0, 0], sizes = [1, 2, 128], strides = [1, 1, 1]} : vector<10x2x128xf32> to vector<1x2x128xf32>
    %93 = vector.shape_cast %92 : vector<1x2x128xf32> to vector<2x128xf32>
    %94 = vector.shape_cast %93 : vector<2x128xf32> to vector<2x1x128xf32>
    %95 = vector.broadcast %48 : vector<2x6x1xf32> to vector<2x6x128xf32>
    %96 = vector.broadcast %94 : vector<2x1x128xf32> to vector<2x6x128xf32>
    %97 = arith.subf %95, %96 : vector<2x6x128xf32>
    %98 = arith.mulf %91, %91 : vector<2x6x128xf32>
    %99 = arith.mulf %97, %97 : vector<2x6x128xf32>
    %100 = arith.addf %98, %99 : vector<2x6x128xf32>
    %101 = arith.minimumf %85, %100 : vector<2x6x128xf32>
    %102 = vector.extract_strided_slice %17 {offsets = [3, 0, 0], sizes = [1, 2, 128], strides = [1, 1, 1]} : vector<10x2x128xf32> to vector<1x2x128xf32>
    %103 = vector.shape_cast %102 : vector<1x2x128xf32> to vector<2x128xf32>
    %104 = vector.shape_cast %103 : vector<2x128xf32> to vector<2x1x128xf32>
    %105 = vector.broadcast %47 : vector<2x6x1xf32> to vector<2x6x128xf32>
    %106 = vector.broadcast %104 : vector<2x1x128xf32> to vector<2x6x128xf32>
    %107 = arith.subf %105, %106 : vector<2x6x128xf32>
    %108 = vector.extract_strided_slice %27 {offsets = [3, 0, 0], sizes = [1, 2, 128], strides = [1, 1, 1]} : vector<10x2x128xf32> to vector<1x2x128xf32>
    %109 = vector.shape_cast %108 : vector<1x2x128xf32> to vector<2x128xf32>
    %110 = vector.shape_cast %109 : vector<2x128xf32> to vector<2x1x128xf32>
    %111 = vector.broadcast %48 : vector<2x6x1xf32> to vector<2x6x128xf32>
    %112 = vector.broadcast %110 : vector<2x1x128xf32> to vector<2x6x128xf32>
    %113 = arith.subf %111, %112 : vector<2x6x128xf32>
    %114 = arith.mulf %107, %107 : vector<2x6x128xf32>
    %115 = arith.mulf %113, %113 : vector<2x6x128xf32>
    %116 = arith.addf %114, %115 : vector<2x6x128xf32>
    %117 = arith.minimumf %101, %116 : vector<2x6x128xf32>
    %118 = vector.extract_strided_slice %17 {offsets = [4, 0, 0], sizes = [1, 2, 128], strides = [1, 1, 1]} : vector<10x2x128xf32> to vector<1x2x128xf32>
    %119 = vector.shape_cast %118 : vector<1x2x128xf32> to vector<2x128xf32>
    %120 = vector.shape_cast %119 : vector<2x128xf32> to vector<2x1x128xf32>
    %121 = vector.broadcast %47 : vector<2x6x1xf32> to vector<2x6x128xf32>
    %122 = vector.broadcast %120 : vector<2x1x128xf32> to vector<2x6x128xf32>
    %123 = arith.subf %121, %122 : vector<2x6x128xf32>
    %124 = vector.extract_strided_slice %27 {offsets = [4, 0, 0], sizes = [1, 2, 128], strides = [1, 1, 1]} : vector<10x2x128xf32> to vector<1x2x128xf32>
    %125 = vector.shape_cast %124 : vector<1x2x128xf32> to vector<2x128xf32>
    %126 = vector.shape_cast %125 : vector<2x128xf32> to vector<2x1x128xf32>
    %127 = vector.broadcast %48 : vector<2x6x1xf32> to vector<2x6x128xf32>
    %128 = vector.broadcast %126 : vector<2x1x128xf32> to vector<2x6x128xf32>
    %129 = arith.subf %127, %128 : vector<2x6x128xf32>
    %130 = arith.mulf %123, %123 : vector<2x6x128xf32>
    %131 = arith.mulf %129, %129 : vector<2x6x128xf32>
    %132 = arith.addf %130, %131 : vector<2x6x128xf32>
    %133 = arith.minimumf %117, %132 : vector<2x6x128xf32>
    %134 = vector.extract_strided_slice %17 {offsets = [5, 0, 0], sizes = [1, 2, 128], strides = [1, 1, 1]} : vector<10x2x128xf32> to vector<1x2x128xf32>
    %135 = vector.shape_cast %134 : vector<1x2x128xf32> to vector<2x128xf32>
    %136 = vector.shape_cast %135 : vector<2x128xf32> to vector<2x1x128xf32>
    %137 = vector.broadcast %47 : vector<2x6x1xf32> to vector<2x6x128xf32>
    %138 = vector.broadcast %136 : vector<2x1x128xf32> to vector<2x6x128xf32>
    %139 = arith.subf %137, %138 : vector<2x6x128xf32>
    %140 = vector.extract_strided_slice %27 {offsets = [5, 0, 0], sizes = [1, 2, 128], strides = [1, 1, 1]} : vector<10x2x128xf32> to vector<1x2x128xf32>
    %141 = vector.shape_cast %140 : vector<1x2x128xf32> to vector<2x128xf32>
    %142 = vector.shape_cast %141 : vector<2x128xf32> to vector<2x1x128xf32>
    %143 = vector.broadcast %48 : vector<2x6x1xf32> to vector<2x6x128xf32>
    %144 = vector.broadcast %142 : vector<2x1x128xf32> to vector<2x6x128xf32>
    %145 = arith.subf %143, %144 : vector<2x6x128xf32>
    %146 = arith.mulf %139, %139 : vector<2x6x128xf32>
    %147 = arith.mulf %145, %145 : vector<2x6x128xf32>
    %148 = arith.addf %146, %147 : vector<2x6x128xf32>
    %149 = arith.minimumf %133, %148 : vector<2x6x128xf32>
    %150 = vector.extract_strided_slice %17 {offsets = [6, 0, 0], sizes = [1, 2, 128], strides = [1, 1, 1]} : vector<10x2x128xf32> to vector<1x2x128xf32>
    %151 = vector.shape_cast %150 : vector<1x2x128xf32> to vector<2x128xf32>
    %152 = vector.shape_cast %151 : vector<2x128xf32> to vector<2x1x128xf32>
    %153 = vector.broadcast %47 : vector<2x6x1xf32> to vector<2x6x128xf32>
    %154 = vector.broadcast %152 : vector<2x1x128xf32> to vector<2x6x128xf32>
    %155 = arith.subf %153, %154 : vector<2x6x128xf32>
    %156 = vector.extract_strided_slice %27 {offsets = [6, 0, 0], sizes = [1, 2, 128], strides = [1, 1, 1]} : vector<10x2x128xf32> to vector<1x2x128xf32>
    %157 = vector.shape_cast %156 : vector<1x2x128xf32> to vector<2x128xf32>
    %158 = vector.shape_cast %157 : vector<2x128xf32> to vector<2x1x128xf32>
    %159 = vector.broadcast %48 : vector<2x6x1xf32> to vector<2x6x128xf32>
    %160 = vector.broadcast %158 : vector<2x1x128xf32> to vector<2x6x128xf32>
    %161 = arith.subf %159, %160 : vector<2x6x128xf32>
    %162 = arith.mulf %155, %155 : vector<2x6x128xf32>
    %163 = arith.mulf %161, %161 : vector<2x6x128xf32>
    %164 = arith.addf %162, %163 : vector<2x6x128xf32>
    %165 = arith.minimumf %149, %164 : vector<2x6x128xf32>
    %166 = vector.extract_strided_slice %17 {offsets = [7, 0, 0], sizes = [1, 2, 128], strides = [1, 1, 1]} : vector<10x2x128xf32> to vector<1x2x128xf32>
    %167 = vector.shape_cast %166 : vector<1x2x128xf32> to vector<2x128xf32>
    %168 = vector.shape_cast %167 : vector<2x128xf32> to vector<2x1x128xf32>
    %169 = vector.broadcast %47 : vector<2x6x1xf32> to vector<2x6x128xf32>
    %170 = vector.broadcast %168 : vector<2x1x128xf32> to vector<2x6x128xf32>
    %171 = arith.subf %169, %170 : vector<2x6x128xf32>
    %172 = vector.extract_strided_slice %27 {offsets = [7, 0, 0], sizes = [1, 2, 128], strides = [1, 1, 1]} : vector<10x2x128xf32> to vector<1x2x128xf32>
    %173 = vector.shape_cast %172 : vector<1x2x128xf32> to vector<2x128xf32>
    %174 = vector.shape_cast %173 : vector<2x128xf32> to vector<2x1x128xf32>
    %175 = vector.broadcast %48 : vector<2x6x1xf32> to vector<2x6x128xf32>
    %176 = vector.broadcast %174 : vector<2x1x128xf32> to vector<2x6x128xf32>
    %177 = arith.subf %175, %176 : vector<2x6x128xf32>
    %178 = arith.mulf %171, %171 : vector<2x6x128xf32>
    %179 = arith.mulf %177, %177 : vector<2x6x128xf32>
    %180 = arith.addf %178, %179 : vector<2x6x128xf32>
    %181 = arith.minimumf %165, %180 : vector<2x6x128xf32>
    %182 = vector.extract_strided_slice %17 {offsets = [8, 0, 0], sizes = [1, 2, 128], strides = [1, 1, 1]} : vector<10x2x128xf32> to vector<1x2x128xf32>
    %183 = vector.shape_cast %182 : vector<1x2x128xf32> to vector<2x128xf32>
    %184 = vector.shape_cast %183 : vector<2x128xf32> to vector<2x1x128xf32>
    %185 = vector.broadcast %47 : vector<2x6x1xf32> to vector<2x6x128xf32>
    %186 = vector.broadcast %184 : vector<2x1x128xf32> to vector<2x6x128xf32>
    %187 = arith.subf %185, %186 : vector<2x6x128xf32>
    %188 = vector.extract_strided_slice %27 {offsets = [8, 0, 0], sizes = [1, 2, 128], strides = [1, 1, 1]} : vector<10x2x128xf32> to vector<1x2x128xf32>
    %189 = vector.shape_cast %188 : vector<1x2x128xf32> to vector<2x128xf32>
    %190 = vector.shape_cast %189 : vector<2x128xf32> to vector<2x1x128xf32>
    %191 = vector.broadcast %48 : vector<2x6x1xf32> to vector<2x6x128xf32>
    %192 = vector.broadcast %190 : vector<2x1x128xf32> to vector<2x6x128xf32>
    %193 = arith.subf %191, %192 : vector<2x6x128xf32>
    %194 = arith.mulf %187, %187 : vector<2x6x128xf32>
    %195 = arith.mulf %193, %193 : vector<2x6x128xf32>
    %196 = arith.addf %194, %195 : vector<2x6x128xf32>
    %197 = arith.minimumf %181, %196 : vector<2x6x128xf32>
    %198 = vector.extract_strided_slice %17 {offsets = [9, 0, 0], sizes = [1, 2, 128], strides = [1, 1, 1]} : vector<10x2x128xf32> to vector<1x2x128xf32>
    %199 = vector.shape_cast %198 : vector<1x2x128xf32> to vector<2x128xf32>
    %200 = vector.shape_cast %199 : vector<2x128xf32> to vector<2x1x128xf32>
    %201 = vector.broadcast %47 : vector<2x6x1xf32> to vector<2x6x128xf32>
    %202 = vector.broadcast %200 : vector<2x1x128xf32> to vector<2x6x128xf32>
    %203 = arith.subf %201, %202 : vector<2x6x128xf32>
    %204 = vector.extract_strided_slice %27 {offsets = [9, 0, 0], sizes = [1, 2, 128], strides = [1, 1, 1]} : vector<10x2x128xf32> to vector<1x2x128xf32>
    %205 = vector.shape_cast %204 : vector<1x2x128xf32> to vector<2x128xf32>
    %206 = vector.shape_cast %205 : vector<2x128xf32> to vector<2x1x128xf32>
    %207 = vector.broadcast %48 : vector<2x6x1xf32> to vector<2x6x128xf32>
    %208 = vector.broadcast %206 : vector<2x1x128xf32> to vector<2x6x128xf32>
    %209 = arith.subf %207, %208 : vector<2x6x128xf32>
    %210 = arith.mulf %203, %203 : vector<2x6x128xf32>
    %211 = arith.mulf %209, %209 : vector<2x6x128xf32>
    %212 = arith.addf %210, %211 : vector<2x6x128xf32>
    %213 = arith.minimumf %197, %212 : vector<2x6x128xf32>
    %cst_23 = arith.constant 0.000000e+00 : f32
    %214 = vector.broadcast %cst_23 : f32 to vector<2x6x128xf32>
    %215 = vector.extract_strided_slice %17 {offsets = [0, 0, 0], sizes = [1, 2, 128], strides = [1, 1, 1]} : vector<10x2x128xf32> to vector<1x2x128xf32>
    %216 = vector.shape_cast %215 : vector<1x2x128xf32> to vector<2x128xf32>
    %217 = vector.shape_cast %216 : vector<2x128xf32> to vector<2x1x128xf32>
    %218 = vector.extract_strided_slice %27 {offsets = [0, 0, 0], sizes = [1, 2, 128], strides = [1, 1, 1]} : vector<10x2x128xf32> to vector<1x2x128xf32>
    %219 = vector.shape_cast %218 : vector<1x2x128xf32> to vector<2x128xf32>
    %220 = vector.shape_cast %219 : vector<2x128xf32> to vector<2x1x128xf32>
    %221 = vector.extract_strided_slice %17 {offsets = [1, 0, 0], sizes = [1, 2, 128], strides = [1, 1, 1]} : vector<10x2x128xf32> to vector<1x2x128xf32>
    %222 = vector.shape_cast %221 : vector<1x2x128xf32> to vector<2x128xf32>
    %223 = vector.shape_cast %222 : vector<2x128xf32> to vector<2x1x128xf32>
    %224 = arith.subf %223, %217 : vector<2x1x128xf32>
    %225 = vector.extract_strided_slice %27 {offsets = [1, 0, 0], sizes = [1, 2, 128], strides = [1, 1, 1]} : vector<10x2x128xf32> to vector<1x2x128xf32>
    %226 = vector.shape_cast %225 : vector<1x2x128xf32> to vector<2x128xf32>
    %227 = vector.shape_cast %226 : vector<2x128xf32> to vector<2x1x128xf32>
    %228 = arith.subf %227, %220 : vector<2x1x128xf32>
    %229 = vector.broadcast %51 : vector<2x6x1xf32> to vector<2x6x128xf32>
    %230 = vector.broadcast %228 : vector<2x1x128xf32> to vector<2x6x128xf32>
    %231 = arith.mulf %229, %230 : vector<2x6x128xf32>
    %232 = vector.broadcast %224 : vector<2x1x128xf32> to vector<2x6x128xf32>
    %233 = vector.broadcast %52 : vector<2x6x1xf32> to vector<2x6x128xf32>
    %234 = arith.mulf %232, %233 : vector<2x6x128xf32>
    %235 = arith.subf %231, %234 : vector<2x6x128xf32>
    %236 = vector.broadcast %217 : vector<2x1x128xf32> to vector<2x6x128xf32>
    %237 = vector.broadcast %49 : vector<2x6x1xf32> to vector<2x6x128xf32>
    %238 = arith.subf %236, %237 : vector<2x6x128xf32>
    %239 = vector.broadcast %220 : vector<2x1x128xf32> to vector<2x6x128xf32>
    %240 = vector.broadcast %50 : vector<2x6x1xf32> to vector<2x6x128xf32>
    %241 = arith.subf %239, %240 : vector<2x6x128xf32>
    %242 = vector.broadcast %228 : vector<2x1x128xf32> to vector<2x6x128xf32>
    %243 = arith.mulf %238, %242 : vector<2x6x128xf32>
    %244 = vector.broadcast %224 : vector<2x1x128xf32> to vector<2x6x128xf32>
    %245 = arith.mulf %241, %244 : vector<2x6x128xf32>
    %246 = arith.subf %243, %245 : vector<2x6x128xf32>
    %247 = vector.broadcast %52 : vector<2x6x1xf32> to vector<2x6x128xf32>
    %248 = arith.mulf %238, %247 : vector<2x6x128xf32>
    %249 = vector.broadcast %51 : vector<2x6x1xf32> to vector<2x6x128xf32>
    %250 = arith.mulf %241, %249 : vector<2x6x128xf32>
    %251 = arith.subf %248, %250 : vector<2x6x128xf32>
    %252 = math.absf %235 : vector<2x6x128xf32>
    %cst_24 = arith.constant 0.000000e+00 : f32
    %253 = vector.broadcast %cst_24 : f32 to vector<2x6x128xf32>
    %254 = arith.cmpf one, %235, %253 : vector<2x6x128xf32>
    %255 = arith.mulf %246, %235 : vector<2x6x128xf32>
    %cst_25 = arith.constant 0.000000e+00 : f32
    %256 = vector.broadcast %cst_25 : f32 to vector<2x6x128xf32>
    %257 = arith.cmpf oge, %255, %256 : vector<2x6x128xf32>
    %258 = arith.andi %254, %257 : vector<2x6x128xi1>
    %259 = math.absf %246 : vector<2x6x128xf32>
    %260 = arith.cmpf ole, %259, %252 : vector<2x6x128xf32>
    %261 = arith.andi %258, %260 : vector<2x6x128xi1>
    %262 = arith.mulf %251, %235 : vector<2x6x128xf32>
    %cst_26 = arith.constant 0.000000e+00 : f32
    %263 = vector.broadcast %cst_26 : f32 to vector<2x6x128xf32>
    %264 = arith.cmpf oge, %262, %263 : vector<2x6x128xf32>
    %265 = arith.andi %261, %264 : vector<2x6x128xi1>
    %266 = math.absf %251 : vector<2x6x128xf32>
    %267 = arith.cmpf ole, %266, %252 : vector<2x6x128xf32>
    %268 = arith.andi %265, %267 : vector<2x6x128xi1>
    %269 = arith.extui %268 : vector<2x6x128xi1> to vector<2x6x128xi32>
    %270 = arith.sitofp %269 : vector<2x6x128xi32> to vector<2x6x128xf32>
    %271 = arith.maximumf %214, %270 : vector<2x6x128xf32>
    %272 = vector.extract_strided_slice %17 {offsets = [1, 0, 0], sizes = [1, 2, 128], strides = [1, 1, 1]} : vector<10x2x128xf32> to vector<1x2x128xf32>
    %273 = vector.shape_cast %272 : vector<1x2x128xf32> to vector<2x128xf32>
    %274 = vector.shape_cast %273 : vector<2x128xf32> to vector<2x1x128xf32>
    %275 = vector.extract_strided_slice %27 {offsets = [1, 0, 0], sizes = [1, 2, 128], strides = [1, 1, 1]} : vector<10x2x128xf32> to vector<1x2x128xf32>
    %276 = vector.shape_cast %275 : vector<1x2x128xf32> to vector<2x128xf32>
    %277 = vector.shape_cast %276 : vector<2x128xf32> to vector<2x1x128xf32>
    %278 = vector.extract_strided_slice %17 {offsets = [2, 0, 0], sizes = [1, 2, 128], strides = [1, 1, 1]} : vector<10x2x128xf32> to vector<1x2x128xf32>
    %279 = vector.shape_cast %278 : vector<1x2x128xf32> to vector<2x128xf32>
    %280 = vector.shape_cast %279 : vector<2x128xf32> to vector<2x1x128xf32>
    %281 = arith.subf %280, %274 : vector<2x1x128xf32>
    %282 = vector.extract_strided_slice %27 {offsets = [2, 0, 0], sizes = [1, 2, 128], strides = [1, 1, 1]} : vector<10x2x128xf32> to vector<1x2x128xf32>
    %283 = vector.shape_cast %282 : vector<1x2x128xf32> to vector<2x128xf32>
    %284 = vector.shape_cast %283 : vector<2x128xf32> to vector<2x1x128xf32>
    %285 = arith.subf %284, %277 : vector<2x1x128xf32>
    %286 = vector.broadcast %51 : vector<2x6x1xf32> to vector<2x6x128xf32>
    %287 = vector.broadcast %285 : vector<2x1x128xf32> to vector<2x6x128xf32>
    %288 = arith.mulf %286, %287 : vector<2x6x128xf32>
    %289 = vector.broadcast %281 : vector<2x1x128xf32> to vector<2x6x128xf32>
    %290 = vector.broadcast %52 : vector<2x6x1xf32> to vector<2x6x128xf32>
    %291 = arith.mulf %289, %290 : vector<2x6x128xf32>
    %292 = arith.subf %288, %291 : vector<2x6x128xf32>
    %293 = vector.broadcast %274 : vector<2x1x128xf32> to vector<2x6x128xf32>
    %294 = vector.broadcast %49 : vector<2x6x1xf32> to vector<2x6x128xf32>
    %295 = arith.subf %293, %294 : vector<2x6x128xf32>
    %296 = vector.broadcast %277 : vector<2x1x128xf32> to vector<2x6x128xf32>
    %297 = vector.broadcast %50 : vector<2x6x1xf32> to vector<2x6x128xf32>
    %298 = arith.subf %296, %297 : vector<2x6x128xf32>
    %299 = vector.broadcast %285 : vector<2x1x128xf32> to vector<2x6x128xf32>
    %300 = arith.mulf %295, %299 : vector<2x6x128xf32>
    %301 = vector.broadcast %281 : vector<2x1x128xf32> to vector<2x6x128xf32>
    %302 = arith.mulf %298, %301 : vector<2x6x128xf32>
    %303 = arith.subf %300, %302 : vector<2x6x128xf32>
    %304 = vector.broadcast %52 : vector<2x6x1xf32> to vector<2x6x128xf32>
    %305 = arith.mulf %295, %304 : vector<2x6x128xf32>
    %306 = vector.broadcast %51 : vector<2x6x1xf32> to vector<2x6x128xf32>
    %307 = arith.mulf %298, %306 : vector<2x6x128xf32>
    %308 = arith.subf %305, %307 : vector<2x6x128xf32>
    %309 = math.absf %292 : vector<2x6x128xf32>
    %cst_27 = arith.constant 0.000000e+00 : f32
    %310 = vector.broadcast %cst_27 : f32 to vector<2x6x128xf32>
    %311 = arith.cmpf one, %292, %310 : vector<2x6x128xf32>
    %312 = arith.mulf %303, %292 : vector<2x6x128xf32>
    %cst_28 = arith.constant 0.000000e+00 : f32
    %313 = vector.broadcast %cst_28 : f32 to vector<2x6x128xf32>
    %314 = arith.cmpf oge, %312, %313 : vector<2x6x128xf32>
    %315 = arith.andi %311, %314 : vector<2x6x128xi1>
    %316 = math.absf %303 : vector<2x6x128xf32>
    %317 = arith.cmpf ole, %316, %309 : vector<2x6x128xf32>
    %318 = arith.andi %315, %317 : vector<2x6x128xi1>
    %319 = arith.mulf %308, %292 : vector<2x6x128xf32>
    %cst_29 = arith.constant 0.000000e+00 : f32
    %320 = vector.broadcast %cst_29 : f32 to vector<2x6x128xf32>
    %321 = arith.cmpf oge, %319, %320 : vector<2x6x128xf32>
    %322 = arith.andi %318, %321 : vector<2x6x128xi1>
    %323 = math.absf %308 : vector<2x6x128xf32>
    %324 = arith.cmpf ole, %323, %309 : vector<2x6x128xf32>
    %325 = arith.andi %322, %324 : vector<2x6x128xi1>
    %326 = arith.extui %325 : vector<2x6x128xi1> to vector<2x6x128xi32>
    %327 = arith.sitofp %326 : vector<2x6x128xi32> to vector<2x6x128xf32>
    %328 = arith.maximumf %271, %327 : vector<2x6x128xf32>
    %329 = vector.extract_strided_slice %17 {offsets = [2, 0, 0], sizes = [1, 2, 128], strides = [1, 1, 1]} : vector<10x2x128xf32> to vector<1x2x128xf32>
    %330 = vector.shape_cast %329 : vector<1x2x128xf32> to vector<2x128xf32>
    %331 = vector.shape_cast %330 : vector<2x128xf32> to vector<2x1x128xf32>
    %332 = vector.extract_strided_slice %27 {offsets = [2, 0, 0], sizes = [1, 2, 128], strides = [1, 1, 1]} : vector<10x2x128xf32> to vector<1x2x128xf32>
    %333 = vector.shape_cast %332 : vector<1x2x128xf32> to vector<2x128xf32>
    %334 = vector.shape_cast %333 : vector<2x128xf32> to vector<2x1x128xf32>
    %335 = vector.extract_strided_slice %17 {offsets = [3, 0, 0], sizes = [1, 2, 128], strides = [1, 1, 1]} : vector<10x2x128xf32> to vector<1x2x128xf32>
    %336 = vector.shape_cast %335 : vector<1x2x128xf32> to vector<2x128xf32>
    %337 = vector.shape_cast %336 : vector<2x128xf32> to vector<2x1x128xf32>
    %338 = arith.subf %337, %331 : vector<2x1x128xf32>
    %339 = vector.extract_strided_slice %27 {offsets = [3, 0, 0], sizes = [1, 2, 128], strides = [1, 1, 1]} : vector<10x2x128xf32> to vector<1x2x128xf32>
    %340 = vector.shape_cast %339 : vector<1x2x128xf32> to vector<2x128xf32>
    %341 = vector.shape_cast %340 : vector<2x128xf32> to vector<2x1x128xf32>
    %342 = arith.subf %341, %334 : vector<2x1x128xf32>
    %343 = vector.broadcast %51 : vector<2x6x1xf32> to vector<2x6x128xf32>
    %344 = vector.broadcast %342 : vector<2x1x128xf32> to vector<2x6x128xf32>
    %345 = arith.mulf %343, %344 : vector<2x6x128xf32>
    %346 = vector.broadcast %338 : vector<2x1x128xf32> to vector<2x6x128xf32>
    %347 = vector.broadcast %52 : vector<2x6x1xf32> to vector<2x6x128xf32>
    %348 = arith.mulf %346, %347 : vector<2x6x128xf32>
    %349 = arith.subf %345, %348 : vector<2x6x128xf32>
    %350 = vector.broadcast %331 : vector<2x1x128xf32> to vector<2x6x128xf32>
    %351 = vector.broadcast %49 : vector<2x6x1xf32> to vector<2x6x128xf32>
    %352 = arith.subf %350, %351 : vector<2x6x128xf32>
    %353 = vector.broadcast %334 : vector<2x1x128xf32> to vector<2x6x128xf32>
    %354 = vector.broadcast %50 : vector<2x6x1xf32> to vector<2x6x128xf32>
    %355 = arith.subf %353, %354 : vector<2x6x128xf32>
    %356 = vector.broadcast %342 : vector<2x1x128xf32> to vector<2x6x128xf32>
    %357 = arith.mulf %352, %356 : vector<2x6x128xf32>
    %358 = vector.broadcast %338 : vector<2x1x128xf32> to vector<2x6x128xf32>
    %359 = arith.mulf %355, %358 : vector<2x6x128xf32>
    %360 = arith.subf %357, %359 : vector<2x6x128xf32>
    %361 = vector.broadcast %52 : vector<2x6x1xf32> to vector<2x6x128xf32>
    %362 = arith.mulf %352, %361 : vector<2x6x128xf32>
    %363 = vector.broadcast %51 : vector<2x6x1xf32> to vector<2x6x128xf32>
    %364 = arith.mulf %355, %363 : vector<2x6x128xf32>
    %365 = arith.subf %362, %364 : vector<2x6x128xf32>
    %366 = math.absf %349 : vector<2x6x128xf32>
    %cst_30 = arith.constant 0.000000e+00 : f32
    %367 = vector.broadcast %cst_30 : f32 to vector<2x6x128xf32>
    %368 = arith.cmpf one, %349, %367 : vector<2x6x128xf32>
    %369 = arith.mulf %360, %349 : vector<2x6x128xf32>
    %cst_31 = arith.constant 0.000000e+00 : f32
    %370 = vector.broadcast %cst_31 : f32 to vector<2x6x128xf32>
    %371 = arith.cmpf oge, %369, %370 : vector<2x6x128xf32>
    %372 = arith.andi %368, %371 : vector<2x6x128xi1>
    %373 = math.absf %360 : vector<2x6x128xf32>
    %374 = arith.cmpf ole, %373, %366 : vector<2x6x128xf32>
    %375 = arith.andi %372, %374 : vector<2x6x128xi1>
    %376 = arith.mulf %365, %349 : vector<2x6x128xf32>
    %cst_32 = arith.constant 0.000000e+00 : f32
    %377 = vector.broadcast %cst_32 : f32 to vector<2x6x128xf32>
    %378 = arith.cmpf oge, %376, %377 : vector<2x6x128xf32>
    %379 = arith.andi %375, %378 : vector<2x6x128xi1>
    %380 = math.absf %365 : vector<2x6x128xf32>
    %381 = arith.cmpf ole, %380, %366 : vector<2x6x128xf32>
    %382 = arith.andi %379, %381 : vector<2x6x128xi1>
    %383 = arith.extui %382 : vector<2x6x128xi1> to vector<2x6x128xi32>
    %384 = arith.sitofp %383 : vector<2x6x128xi32> to vector<2x6x128xf32>
    %385 = arith.maximumf %328, %384 : vector<2x6x128xf32>
    %386 = vector.extract_strided_slice %17 {offsets = [3, 0, 0], sizes = [1, 2, 128], strides = [1, 1, 1]} : vector<10x2x128xf32> to vector<1x2x128xf32>
    %387 = vector.shape_cast %386 : vector<1x2x128xf32> to vector<2x128xf32>
    %388 = vector.shape_cast %387 : vector<2x128xf32> to vector<2x1x128xf32>
    %389 = vector.extract_strided_slice %27 {offsets = [3, 0, 0], sizes = [1, 2, 128], strides = [1, 1, 1]} : vector<10x2x128xf32> to vector<1x2x128xf32>
    %390 = vector.shape_cast %389 : vector<1x2x128xf32> to vector<2x128xf32>
    %391 = vector.shape_cast %390 : vector<2x128xf32> to vector<2x1x128xf32>
    %392 = vector.extract_strided_slice %17 {offsets = [4, 0, 0], sizes = [1, 2, 128], strides = [1, 1, 1]} : vector<10x2x128xf32> to vector<1x2x128xf32>
    %393 = vector.shape_cast %392 : vector<1x2x128xf32> to vector<2x128xf32>
    %394 = vector.shape_cast %393 : vector<2x128xf32> to vector<2x1x128xf32>
    %395 = arith.subf %394, %388 : vector<2x1x128xf32>
    %396 = vector.extract_strided_slice %27 {offsets = [4, 0, 0], sizes = [1, 2, 128], strides = [1, 1, 1]} : vector<10x2x128xf32> to vector<1x2x128xf32>
    %397 = vector.shape_cast %396 : vector<1x2x128xf32> to vector<2x128xf32>
    %398 = vector.shape_cast %397 : vector<2x128xf32> to vector<2x1x128xf32>
    %399 = arith.subf %398, %391 : vector<2x1x128xf32>
    %400 = vector.broadcast %51 : vector<2x6x1xf32> to vector<2x6x128xf32>
    %401 = vector.broadcast %399 : vector<2x1x128xf32> to vector<2x6x128xf32>
    %402 = arith.mulf %400, %401 : vector<2x6x128xf32>
    %403 = vector.broadcast %395 : vector<2x1x128xf32> to vector<2x6x128xf32>
    %404 = vector.broadcast %52 : vector<2x6x1xf32> to vector<2x6x128xf32>
    %405 = arith.mulf %403, %404 : vector<2x6x128xf32>
    %406 = arith.subf %402, %405 : vector<2x6x128xf32>
    %407 = vector.broadcast %388 : vector<2x1x128xf32> to vector<2x6x128xf32>
    %408 = vector.broadcast %49 : vector<2x6x1xf32> to vector<2x6x128xf32>
    %409 = arith.subf %407, %408 : vector<2x6x128xf32>
    %410 = vector.broadcast %391 : vector<2x1x128xf32> to vector<2x6x128xf32>
    %411 = vector.broadcast %50 : vector<2x6x1xf32> to vector<2x6x128xf32>
    %412 = arith.subf %410, %411 : vector<2x6x128xf32>
    %413 = vector.broadcast %399 : vector<2x1x128xf32> to vector<2x6x128xf32>
    %414 = arith.mulf %409, %413 : vector<2x6x128xf32>
    %415 = vector.broadcast %395 : vector<2x1x128xf32> to vector<2x6x128xf32>
    %416 = arith.mulf %412, %415 : vector<2x6x128xf32>
    %417 = arith.subf %414, %416 : vector<2x6x128xf32>
    %418 = vector.broadcast %52 : vector<2x6x1xf32> to vector<2x6x128xf32>
    %419 = arith.mulf %409, %418 : vector<2x6x128xf32>
    %420 = vector.broadcast %51 : vector<2x6x1xf32> to vector<2x6x128xf32>
    %421 = arith.mulf %412, %420 : vector<2x6x128xf32>
    %422 = arith.subf %419, %421 : vector<2x6x128xf32>
    %423 = math.absf %406 : vector<2x6x128xf32>
    %cst_33 = arith.constant 0.000000e+00 : f32
    %424 = vector.broadcast %cst_33 : f32 to vector<2x6x128xf32>
    %425 = arith.cmpf one, %406, %424 : vector<2x6x128xf32>
    %426 = arith.mulf %417, %406 : vector<2x6x128xf32>
    %cst_34 = arith.constant 0.000000e+00 : f32
    %427 = vector.broadcast %cst_34 : f32 to vector<2x6x128xf32>
    %428 = arith.cmpf oge, %426, %427 : vector<2x6x128xf32>
    %429 = arith.andi %425, %428 : vector<2x6x128xi1>
    %430 = math.absf %417 : vector<2x6x128xf32>
    %431 = arith.cmpf ole, %430, %423 : vector<2x6x128xf32>
    %432 = arith.andi %429, %431 : vector<2x6x128xi1>
    %433 = arith.mulf %422, %406 : vector<2x6x128xf32>
    %cst_35 = arith.constant 0.000000e+00 : f32
    %434 = vector.broadcast %cst_35 : f32 to vector<2x6x128xf32>
    %435 = arith.cmpf oge, %433, %434 : vector<2x6x128xf32>
    %436 = arith.andi %432, %435 : vector<2x6x128xi1>
    %437 = math.absf %422 : vector<2x6x128xf32>
    %438 = arith.cmpf ole, %437, %423 : vector<2x6x128xf32>
    %439 = arith.andi %436, %438 : vector<2x6x128xi1>
    %440 = arith.extui %439 : vector<2x6x128xi1> to vector<2x6x128xi32>
    %441 = arith.sitofp %440 : vector<2x6x128xi32> to vector<2x6x128xf32>
    %442 = arith.maximumf %385, %441 : vector<2x6x128xf32>
    %443 = vector.extract_strided_slice %17 {offsets = [4, 0, 0], sizes = [1, 2, 128], strides = [1, 1, 1]} : vector<10x2x128xf32> to vector<1x2x128xf32>
    %444 = vector.shape_cast %443 : vector<1x2x128xf32> to vector<2x128xf32>
    %445 = vector.shape_cast %444 : vector<2x128xf32> to vector<2x1x128xf32>
    %446 = vector.extract_strided_slice %27 {offsets = [4, 0, 0], sizes = [1, 2, 128], strides = [1, 1, 1]} : vector<10x2x128xf32> to vector<1x2x128xf32>
    %447 = vector.shape_cast %446 : vector<1x2x128xf32> to vector<2x128xf32>
    %448 = vector.shape_cast %447 : vector<2x128xf32> to vector<2x1x128xf32>
    %449 = vector.extract_strided_slice %17 {offsets = [5, 0, 0], sizes = [1, 2, 128], strides = [1, 1, 1]} : vector<10x2x128xf32> to vector<1x2x128xf32>
    %450 = vector.shape_cast %449 : vector<1x2x128xf32> to vector<2x128xf32>
    %451 = vector.shape_cast %450 : vector<2x128xf32> to vector<2x1x128xf32>
    %452 = arith.subf %451, %445 : vector<2x1x128xf32>
    %453 = vector.extract_strided_slice %27 {offsets = [5, 0, 0], sizes = [1, 2, 128], strides = [1, 1, 1]} : vector<10x2x128xf32> to vector<1x2x128xf32>
    %454 = vector.shape_cast %453 : vector<1x2x128xf32> to vector<2x128xf32>
    %455 = vector.shape_cast %454 : vector<2x128xf32> to vector<2x1x128xf32>
    %456 = arith.subf %455, %448 : vector<2x1x128xf32>
    %457 = vector.broadcast %51 : vector<2x6x1xf32> to vector<2x6x128xf32>
    %458 = vector.broadcast %456 : vector<2x1x128xf32> to vector<2x6x128xf32>
    %459 = arith.mulf %457, %458 : vector<2x6x128xf32>
    %460 = vector.broadcast %452 : vector<2x1x128xf32> to vector<2x6x128xf32>
    %461 = vector.broadcast %52 : vector<2x6x1xf32> to vector<2x6x128xf32>
    %462 = arith.mulf %460, %461 : vector<2x6x128xf32>
    %463 = arith.subf %459, %462 : vector<2x6x128xf32>
    %464 = vector.broadcast %445 : vector<2x1x128xf32> to vector<2x6x128xf32>
    %465 = vector.broadcast %49 : vector<2x6x1xf32> to vector<2x6x128xf32>
    %466 = arith.subf %464, %465 : vector<2x6x128xf32>
    %467 = vector.broadcast %448 : vector<2x1x128xf32> to vector<2x6x128xf32>
    %468 = vector.broadcast %50 : vector<2x6x1xf32> to vector<2x6x128xf32>
    %469 = arith.subf %467, %468 : vector<2x6x128xf32>
    %470 = vector.broadcast %456 : vector<2x1x128xf32> to vector<2x6x128xf32>
    %471 = arith.mulf %466, %470 : vector<2x6x128xf32>
    %472 = vector.broadcast %452 : vector<2x1x128xf32> to vector<2x6x128xf32>
    %473 = arith.mulf %469, %472 : vector<2x6x128xf32>
    %474 = arith.subf %471, %473 : vector<2x6x128xf32>
    %475 = vector.broadcast %52 : vector<2x6x1xf32> to vector<2x6x128xf32>
    %476 = arith.mulf %466, %475 : vector<2x6x128xf32>
    %477 = vector.broadcast %51 : vector<2x6x1xf32> to vector<2x6x128xf32>
    %478 = arith.mulf %469, %477 : vector<2x6x128xf32>
    %479 = arith.subf %476, %478 : vector<2x6x128xf32>
    %480 = math.absf %463 : vector<2x6x128xf32>
    %cst_36 = arith.constant 0.000000e+00 : f32
    %481 = vector.broadcast %cst_36 : f32 to vector<2x6x128xf32>
    %482 = arith.cmpf one, %463, %481 : vector<2x6x128xf32>
    %483 = arith.mulf %474, %463 : vector<2x6x128xf32>
    %cst_37 = arith.constant 0.000000e+00 : f32
    %484 = vector.broadcast %cst_37 : f32 to vector<2x6x128xf32>
    %485 = arith.cmpf oge, %483, %484 : vector<2x6x128xf32>
    %486 = arith.andi %482, %485 : vector<2x6x128xi1>
    %487 = math.absf %474 : vector<2x6x128xf32>
    %488 = arith.cmpf ole, %487, %480 : vector<2x6x128xf32>
    %489 = arith.andi %486, %488 : vector<2x6x128xi1>
    %490 = arith.mulf %479, %463 : vector<2x6x128xf32>
    %cst_38 = arith.constant 0.000000e+00 : f32
    %491 = vector.broadcast %cst_38 : f32 to vector<2x6x128xf32>
    %492 = arith.cmpf oge, %490, %491 : vector<2x6x128xf32>
    %493 = arith.andi %489, %492 : vector<2x6x128xi1>
    %494 = math.absf %479 : vector<2x6x128xf32>
    %495 = arith.cmpf ole, %494, %480 : vector<2x6x128xf32>
    %496 = arith.andi %493, %495 : vector<2x6x128xi1>
    %497 = arith.extui %496 : vector<2x6x128xi1> to vector<2x6x128xi32>
    %498 = arith.sitofp %497 : vector<2x6x128xi32> to vector<2x6x128xf32>
    %499 = arith.maximumf %442, %498 : vector<2x6x128xf32>
    %500 = vector.extract_strided_slice %17 {offsets = [5, 0, 0], sizes = [1, 2, 128], strides = [1, 1, 1]} : vector<10x2x128xf32> to vector<1x2x128xf32>
    %501 = vector.shape_cast %500 : vector<1x2x128xf32> to vector<2x128xf32>
    %502 = vector.shape_cast %501 : vector<2x128xf32> to vector<2x1x128xf32>
    %503 = vector.extract_strided_slice %27 {offsets = [5, 0, 0], sizes = [1, 2, 128], strides = [1, 1, 1]} : vector<10x2x128xf32> to vector<1x2x128xf32>
    %504 = vector.shape_cast %503 : vector<1x2x128xf32> to vector<2x128xf32>
    %505 = vector.shape_cast %504 : vector<2x128xf32> to vector<2x1x128xf32>
    %506 = vector.extract_strided_slice %17 {offsets = [6, 0, 0], sizes = [1, 2, 128], strides = [1, 1, 1]} : vector<10x2x128xf32> to vector<1x2x128xf32>
    %507 = vector.shape_cast %506 : vector<1x2x128xf32> to vector<2x128xf32>
    %508 = vector.shape_cast %507 : vector<2x128xf32> to vector<2x1x128xf32>
    %509 = arith.subf %508, %502 : vector<2x1x128xf32>
    %510 = vector.extract_strided_slice %27 {offsets = [6, 0, 0], sizes = [1, 2, 128], strides = [1, 1, 1]} : vector<10x2x128xf32> to vector<1x2x128xf32>
    %511 = vector.shape_cast %510 : vector<1x2x128xf32> to vector<2x128xf32>
    %512 = vector.shape_cast %511 : vector<2x128xf32> to vector<2x1x128xf32>
    %513 = arith.subf %512, %505 : vector<2x1x128xf32>
    %514 = vector.broadcast %51 : vector<2x6x1xf32> to vector<2x6x128xf32>
    %515 = vector.broadcast %513 : vector<2x1x128xf32> to vector<2x6x128xf32>
    %516 = arith.mulf %514, %515 : vector<2x6x128xf32>
    %517 = vector.broadcast %509 : vector<2x1x128xf32> to vector<2x6x128xf32>
    %518 = vector.broadcast %52 : vector<2x6x1xf32> to vector<2x6x128xf32>
    %519 = arith.mulf %517, %518 : vector<2x6x128xf32>
    %520 = arith.subf %516, %519 : vector<2x6x128xf32>
    %521 = vector.broadcast %502 : vector<2x1x128xf32> to vector<2x6x128xf32>
    %522 = vector.broadcast %49 : vector<2x6x1xf32> to vector<2x6x128xf32>
    %523 = arith.subf %521, %522 : vector<2x6x128xf32>
    %524 = vector.broadcast %505 : vector<2x1x128xf32> to vector<2x6x128xf32>
    %525 = vector.broadcast %50 : vector<2x6x1xf32> to vector<2x6x128xf32>
    %526 = arith.subf %524, %525 : vector<2x6x128xf32>
    %527 = vector.broadcast %513 : vector<2x1x128xf32> to vector<2x6x128xf32>
    %528 = arith.mulf %523, %527 : vector<2x6x128xf32>
    %529 = vector.broadcast %509 : vector<2x1x128xf32> to vector<2x6x128xf32>
    %530 = arith.mulf %526, %529 : vector<2x6x128xf32>
    %531 = arith.subf %528, %530 : vector<2x6x128xf32>
    %532 = vector.broadcast %52 : vector<2x6x1xf32> to vector<2x6x128xf32>
    %533 = arith.mulf %523, %532 : vector<2x6x128xf32>
    %534 = vector.broadcast %51 : vector<2x6x1xf32> to vector<2x6x128xf32>
    %535 = arith.mulf %526, %534 : vector<2x6x128xf32>
    %536 = arith.subf %533, %535 : vector<2x6x128xf32>
    %537 = math.absf %520 : vector<2x6x128xf32>
    %cst_39 = arith.constant 0.000000e+00 : f32
    %538 = vector.broadcast %cst_39 : f32 to vector<2x6x128xf32>
    %539 = arith.cmpf one, %520, %538 : vector<2x6x128xf32>
    %540 = arith.mulf %531, %520 : vector<2x6x128xf32>
    %cst_40 = arith.constant 0.000000e+00 : f32
    %541 = vector.broadcast %cst_40 : f32 to vector<2x6x128xf32>
    %542 = arith.cmpf oge, %540, %541 : vector<2x6x128xf32>
    %543 = arith.andi %539, %542 : vector<2x6x128xi1>
    %544 = math.absf %531 : vector<2x6x128xf32>
    %545 = arith.cmpf ole, %544, %537 : vector<2x6x128xf32>
    %546 = arith.andi %543, %545 : vector<2x6x128xi1>
    %547 = arith.mulf %536, %520 : vector<2x6x128xf32>
    %cst_41 = arith.constant 0.000000e+00 : f32
    %548 = vector.broadcast %cst_41 : f32 to vector<2x6x128xf32>
    %549 = arith.cmpf oge, %547, %548 : vector<2x6x128xf32>
    %550 = arith.andi %546, %549 : vector<2x6x128xi1>
    %551 = math.absf %536 : vector<2x6x128xf32>
    %552 = arith.cmpf ole, %551, %537 : vector<2x6x128xf32>
    %553 = arith.andi %550, %552 : vector<2x6x128xi1>
    %554 = arith.extui %553 : vector<2x6x128xi1> to vector<2x6x128xi32>
    %555 = arith.sitofp %554 : vector<2x6x128xi32> to vector<2x6x128xf32>
    %556 = arith.maximumf %499, %555 : vector<2x6x128xf32>
    %557 = vector.extract_strided_slice %17 {offsets = [6, 0, 0], sizes = [1, 2, 128], strides = [1, 1, 1]} : vector<10x2x128xf32> to vector<1x2x128xf32>
    %558 = vector.shape_cast %557 : vector<1x2x128xf32> to vector<2x128xf32>
    %559 = vector.shape_cast %558 : vector<2x128xf32> to vector<2x1x128xf32>
    %560 = vector.extract_strided_slice %27 {offsets = [6, 0, 0], sizes = [1, 2, 128], strides = [1, 1, 1]} : vector<10x2x128xf32> to vector<1x2x128xf32>
    %561 = vector.shape_cast %560 : vector<1x2x128xf32> to vector<2x128xf32>
    %562 = vector.shape_cast %561 : vector<2x128xf32> to vector<2x1x128xf32>
    %563 = vector.extract_strided_slice %17 {offsets = [7, 0, 0], sizes = [1, 2, 128], strides = [1, 1, 1]} : vector<10x2x128xf32> to vector<1x2x128xf32>
    %564 = vector.shape_cast %563 : vector<1x2x128xf32> to vector<2x128xf32>
    %565 = vector.shape_cast %564 : vector<2x128xf32> to vector<2x1x128xf32>
    %566 = arith.subf %565, %559 : vector<2x1x128xf32>
    %567 = vector.extract_strided_slice %27 {offsets = [7, 0, 0], sizes = [1, 2, 128], strides = [1, 1, 1]} : vector<10x2x128xf32> to vector<1x2x128xf32>
    %568 = vector.shape_cast %567 : vector<1x2x128xf32> to vector<2x128xf32>
    %569 = vector.shape_cast %568 : vector<2x128xf32> to vector<2x1x128xf32>
    %570 = arith.subf %569, %562 : vector<2x1x128xf32>
    %571 = vector.broadcast %51 : vector<2x6x1xf32> to vector<2x6x128xf32>
    %572 = vector.broadcast %570 : vector<2x1x128xf32> to vector<2x6x128xf32>
    %573 = arith.mulf %571, %572 : vector<2x6x128xf32>
    %574 = vector.broadcast %566 : vector<2x1x128xf32> to vector<2x6x128xf32>
    %575 = vector.broadcast %52 : vector<2x6x1xf32> to vector<2x6x128xf32>
    %576 = arith.mulf %574, %575 : vector<2x6x128xf32>
    %577 = arith.subf %573, %576 : vector<2x6x128xf32>
    %578 = vector.broadcast %559 : vector<2x1x128xf32> to vector<2x6x128xf32>
    %579 = vector.broadcast %49 : vector<2x6x1xf32> to vector<2x6x128xf32>
    %580 = arith.subf %578, %579 : vector<2x6x128xf32>
    %581 = vector.broadcast %562 : vector<2x1x128xf32> to vector<2x6x128xf32>
    %582 = vector.broadcast %50 : vector<2x6x1xf32> to vector<2x6x128xf32>
    %583 = arith.subf %581, %582 : vector<2x6x128xf32>
    %584 = vector.broadcast %570 : vector<2x1x128xf32> to vector<2x6x128xf32>
    %585 = arith.mulf %580, %584 : vector<2x6x128xf32>
    %586 = vector.broadcast %566 : vector<2x1x128xf32> to vector<2x6x128xf32>
    %587 = arith.mulf %583, %586 : vector<2x6x128xf32>
    %588 = arith.subf %585, %587 : vector<2x6x128xf32>
    %589 = vector.broadcast %52 : vector<2x6x1xf32> to vector<2x6x128xf32>
    %590 = arith.mulf %580, %589 : vector<2x6x128xf32>
    %591 = vector.broadcast %51 : vector<2x6x1xf32> to vector<2x6x128xf32>
    %592 = arith.mulf %583, %591 : vector<2x6x128xf32>
    %593 = arith.subf %590, %592 : vector<2x6x128xf32>
    %594 = math.absf %577 : vector<2x6x128xf32>
    %cst_42 = arith.constant 0.000000e+00 : f32
    %595 = vector.broadcast %cst_42 : f32 to vector<2x6x128xf32>
    %596 = arith.cmpf one, %577, %595 : vector<2x6x128xf32>
    %597 = arith.mulf %588, %577 : vector<2x6x128xf32>
    %cst_43 = arith.constant 0.000000e+00 : f32
    %598 = vector.broadcast %cst_43 : f32 to vector<2x6x128xf32>
    %599 = arith.cmpf oge, %597, %598 : vector<2x6x128xf32>
    %600 = arith.andi %596, %599 : vector<2x6x128xi1>
    %601 = math.absf %588 : vector<2x6x128xf32>
    %602 = arith.cmpf ole, %601, %594 : vector<2x6x128xf32>
    %603 = arith.andi %600, %602 : vector<2x6x128xi1>
    %604 = arith.mulf %593, %577 : vector<2x6x128xf32>
    %cst_44 = arith.constant 0.000000e+00 : f32
    %605 = vector.broadcast %cst_44 : f32 to vector<2x6x128xf32>
    %606 = arith.cmpf oge, %604, %605 : vector<2x6x128xf32>
    %607 = arith.andi %603, %606 : vector<2x6x128xi1>
    %608 = math.absf %593 : vector<2x6x128xf32>
    %609 = arith.cmpf ole, %608, %594 : vector<2x6x128xf32>
    %610 = arith.andi %607, %609 : vector<2x6x128xi1>
    %611 = arith.extui %610 : vector<2x6x128xi1> to vector<2x6x128xi32>
    %612 = arith.sitofp %611 : vector<2x6x128xi32> to vector<2x6x128xf32>
    %613 = arith.maximumf %556, %612 : vector<2x6x128xf32>
    %614 = vector.extract_strided_slice %17 {offsets = [7, 0, 0], sizes = [1, 2, 128], strides = [1, 1, 1]} : vector<10x2x128xf32> to vector<1x2x128xf32>
    %615 = vector.shape_cast %614 : vector<1x2x128xf32> to vector<2x128xf32>
    %616 = vector.shape_cast %615 : vector<2x128xf32> to vector<2x1x128xf32>
    %617 = vector.extract_strided_slice %27 {offsets = [7, 0, 0], sizes = [1, 2, 128], strides = [1, 1, 1]} : vector<10x2x128xf32> to vector<1x2x128xf32>
    %618 = vector.shape_cast %617 : vector<1x2x128xf32> to vector<2x128xf32>
    %619 = vector.shape_cast %618 : vector<2x128xf32> to vector<2x1x128xf32>
    %620 = vector.extract_strided_slice %17 {offsets = [8, 0, 0], sizes = [1, 2, 128], strides = [1, 1, 1]} : vector<10x2x128xf32> to vector<1x2x128xf32>
    %621 = vector.shape_cast %620 : vector<1x2x128xf32> to vector<2x128xf32>
    %622 = vector.shape_cast %621 : vector<2x128xf32> to vector<2x1x128xf32>
    %623 = arith.subf %622, %616 : vector<2x1x128xf32>
    %624 = vector.extract_strided_slice %27 {offsets = [8, 0, 0], sizes = [1, 2, 128], strides = [1, 1, 1]} : vector<10x2x128xf32> to vector<1x2x128xf32>
    %625 = vector.shape_cast %624 : vector<1x2x128xf32> to vector<2x128xf32>
    %626 = vector.shape_cast %625 : vector<2x128xf32> to vector<2x1x128xf32>
    %627 = arith.subf %626, %619 : vector<2x1x128xf32>
    %628 = vector.broadcast %51 : vector<2x6x1xf32> to vector<2x6x128xf32>
    %629 = vector.broadcast %627 : vector<2x1x128xf32> to vector<2x6x128xf32>
    %630 = arith.mulf %628, %629 : vector<2x6x128xf32>
    %631 = vector.broadcast %623 : vector<2x1x128xf32> to vector<2x6x128xf32>
    %632 = vector.broadcast %52 : vector<2x6x1xf32> to vector<2x6x128xf32>
    %633 = arith.mulf %631, %632 : vector<2x6x128xf32>
    %634 = arith.subf %630, %633 : vector<2x6x128xf32>
    %635 = vector.broadcast %616 : vector<2x1x128xf32> to vector<2x6x128xf32>
    %636 = vector.broadcast %49 : vector<2x6x1xf32> to vector<2x6x128xf32>
    %637 = arith.subf %635, %636 : vector<2x6x128xf32>
    %638 = vector.broadcast %619 : vector<2x1x128xf32> to vector<2x6x128xf32>
    %639 = vector.broadcast %50 : vector<2x6x1xf32> to vector<2x6x128xf32>
    %640 = arith.subf %638, %639 : vector<2x6x128xf32>
    %641 = vector.broadcast %627 : vector<2x1x128xf32> to vector<2x6x128xf32>
    %642 = arith.mulf %637, %641 : vector<2x6x128xf32>
    %643 = vector.broadcast %623 : vector<2x1x128xf32> to vector<2x6x128xf32>
    %644 = arith.mulf %640, %643 : vector<2x6x128xf32>
    %645 = arith.subf %642, %644 : vector<2x6x128xf32>
    %646 = vector.broadcast %52 : vector<2x6x1xf32> to vector<2x6x128xf32>
    %647 = arith.mulf %637, %646 : vector<2x6x128xf32>
    %648 = vector.broadcast %51 : vector<2x6x1xf32> to vector<2x6x128xf32>
    %649 = arith.mulf %640, %648 : vector<2x6x128xf32>
    %650 = arith.subf %647, %649 : vector<2x6x128xf32>
    %651 = math.absf %634 : vector<2x6x128xf32>
    %cst_45 = arith.constant 0.000000e+00 : f32
    %652 = vector.broadcast %cst_45 : f32 to vector<2x6x128xf32>
    %653 = arith.cmpf one, %634, %652 : vector<2x6x128xf32>
    %654 = arith.mulf %645, %634 : vector<2x6x128xf32>
    %cst_46 = arith.constant 0.000000e+00 : f32
    %655 = vector.broadcast %cst_46 : f32 to vector<2x6x128xf32>
    %656 = arith.cmpf oge, %654, %655 : vector<2x6x128xf32>
    %657 = arith.andi %653, %656 : vector<2x6x128xi1>
    %658 = math.absf %645 : vector<2x6x128xf32>
    %659 = arith.cmpf ole, %658, %651 : vector<2x6x128xf32>
    %660 = arith.andi %657, %659 : vector<2x6x128xi1>
    %661 = arith.mulf %650, %634 : vector<2x6x128xf32>
    %cst_47 = arith.constant 0.000000e+00 : f32
    %662 = vector.broadcast %cst_47 : f32 to vector<2x6x128xf32>
    %663 = arith.cmpf oge, %661, %662 : vector<2x6x128xf32>
    %664 = arith.andi %660, %663 : vector<2x6x128xi1>
    %665 = math.absf %650 : vector<2x6x128xf32>
    %666 = arith.cmpf ole, %665, %651 : vector<2x6x128xf32>
    %667 = arith.andi %664, %666 : vector<2x6x128xi1>
    %668 = arith.extui %667 : vector<2x6x128xi1> to vector<2x6x128xi32>
    %669 = arith.sitofp %668 : vector<2x6x128xi32> to vector<2x6x128xf32>
    %670 = arith.maximumf %613, %669 : vector<2x6x128xf32>
    %671 = vector.extract_strided_slice %17 {offsets = [8, 0, 0], sizes = [1, 2, 128], strides = [1, 1, 1]} : vector<10x2x128xf32> to vector<1x2x128xf32>
    %672 = vector.shape_cast %671 : vector<1x2x128xf32> to vector<2x128xf32>
    %673 = vector.shape_cast %672 : vector<2x128xf32> to vector<2x1x128xf32>
    %674 = vector.extract_strided_slice %27 {offsets = [8, 0, 0], sizes = [1, 2, 128], strides = [1, 1, 1]} : vector<10x2x128xf32> to vector<1x2x128xf32>
    %675 = vector.shape_cast %674 : vector<1x2x128xf32> to vector<2x128xf32>
    %676 = vector.shape_cast %675 : vector<2x128xf32> to vector<2x1x128xf32>
    %677 = vector.extract_strided_slice %17 {offsets = [9, 0, 0], sizes = [1, 2, 128], strides = [1, 1, 1]} : vector<10x2x128xf32> to vector<1x2x128xf32>
    %678 = vector.shape_cast %677 : vector<1x2x128xf32> to vector<2x128xf32>
    %679 = vector.shape_cast %678 : vector<2x128xf32> to vector<2x1x128xf32>
    %680 = arith.subf %679, %673 : vector<2x1x128xf32>
    %681 = vector.extract_strided_slice %27 {offsets = [9, 0, 0], sizes = [1, 2, 128], strides = [1, 1, 1]} : vector<10x2x128xf32> to vector<1x2x128xf32>
    %682 = vector.shape_cast %681 : vector<1x2x128xf32> to vector<2x128xf32>
    %683 = vector.shape_cast %682 : vector<2x128xf32> to vector<2x1x128xf32>
    %684 = arith.subf %683, %676 : vector<2x1x128xf32>
    %685 = vector.broadcast %51 : vector<2x6x1xf32> to vector<2x6x128xf32>
    %686 = vector.broadcast %684 : vector<2x1x128xf32> to vector<2x6x128xf32>
    %687 = arith.mulf %685, %686 : vector<2x6x128xf32>
    %688 = vector.broadcast %680 : vector<2x1x128xf32> to vector<2x6x128xf32>
    %689 = vector.broadcast %52 : vector<2x6x1xf32> to vector<2x6x128xf32>
    %690 = arith.mulf %688, %689 : vector<2x6x128xf32>
    %691 = arith.subf %687, %690 : vector<2x6x128xf32>
    %692 = vector.broadcast %673 : vector<2x1x128xf32> to vector<2x6x128xf32>
    %693 = vector.broadcast %49 : vector<2x6x1xf32> to vector<2x6x128xf32>
    %694 = arith.subf %692, %693 : vector<2x6x128xf32>
    %695 = vector.broadcast %676 : vector<2x1x128xf32> to vector<2x6x128xf32>
    %696 = vector.broadcast %50 : vector<2x6x1xf32> to vector<2x6x128xf32>
    %697 = arith.subf %695, %696 : vector<2x6x128xf32>
    %698 = vector.broadcast %684 : vector<2x1x128xf32> to vector<2x6x128xf32>
    %699 = arith.mulf %694, %698 : vector<2x6x128xf32>
    %700 = vector.broadcast %680 : vector<2x1x128xf32> to vector<2x6x128xf32>
    %701 = arith.mulf %697, %700 : vector<2x6x128xf32>
    %702 = arith.subf %699, %701 : vector<2x6x128xf32>
    %703 = vector.broadcast %52 : vector<2x6x1xf32> to vector<2x6x128xf32>
    %704 = arith.mulf %694, %703 : vector<2x6x128xf32>
    %705 = vector.broadcast %51 : vector<2x6x1xf32> to vector<2x6x128xf32>
    %706 = arith.mulf %697, %705 : vector<2x6x128xf32>
    %707 = arith.subf %704, %706 : vector<2x6x128xf32>
    %708 = math.absf %691 : vector<2x6x128xf32>
    %cst_48 = arith.constant 0.000000e+00 : f32
    %709 = vector.broadcast %cst_48 : f32 to vector<2x6x128xf32>
    %710 = arith.cmpf one, %691, %709 : vector<2x6x128xf32>
    %711 = arith.mulf %702, %691 : vector<2x6x128xf32>
    %cst_49 = arith.constant 0.000000e+00 : f32
    %712 = vector.broadcast %cst_49 : f32 to vector<2x6x128xf32>
    %713 = arith.cmpf oge, %711, %712 : vector<2x6x128xf32>
    %714 = arith.andi %710, %713 : vector<2x6x128xi1>
    %715 = math.absf %702 : vector<2x6x128xf32>
    %716 = arith.cmpf ole, %715, %708 : vector<2x6x128xf32>
    %717 = arith.andi %714, %716 : vector<2x6x128xi1>
    %718 = arith.mulf %707, %691 : vector<2x6x128xf32>
    %cst_50 = arith.constant 0.000000e+00 : f32
    %719 = vector.broadcast %cst_50 : f32 to vector<2x6x128xf32>
    %720 = arith.cmpf oge, %718, %719 : vector<2x6x128xf32>
    %721 = arith.andi %717, %720 : vector<2x6x128xi1>
    %722 = math.absf %707 : vector<2x6x128xf32>
    %723 = arith.cmpf ole, %722, %708 : vector<2x6x128xf32>
    %724 = arith.andi %721, %723 : vector<2x6x128xi1>
    %725 = arith.extui %724 : vector<2x6x128xi1> to vector<2x6x128xi32>
    %726 = arith.sitofp %725 : vector<2x6x128xi32> to vector<2x6x128xf32>
    %727 = arith.maximumf %670, %726 : vector<2x6x128xf32>
    %cst_51 = arith.constant dense<0x7F800000> : vector<2x6xf32>
    %728 = vector.multi_reduction <minimumf>, %213, %cst_51 [2] : vector<2x6x128xf32> to vector<2x6xf32>
    %729 = vector.shape_cast %728 : vector<2x6xf32> to vector<2x6x1xf32>
    %730 = tpu.iota {dimensions = array<i32: 2>} : vector<2x6x128xi32>
    %731 = vector.broadcast %729 : vector<2x6x1xf32> to vector<2x6x128xf32>
    %732 = arith.cmpf oeq, %213, %731 : vector<2x6x128xf32>
    %c128_i32 = arith.constant 128 : i32
    %733 = vector.broadcast %c128_i32 : i32 to vector<2x6x128xi32>
    %734 = arith.select %732, %730, %733 : vector<2x6x128xi1>, vector<2x6x128xi32>
    %cst_52 = arith.constant dense<2147483647> : vector<2x6xi32>
    %735 = vector.multi_reduction <minsi>, %734, %cst_52 [2] : vector<2x6x128xi32> to vector<2x6xi32>
    %736 = vector.shape_cast %735 : vector<2x6xi32> to vector<2x6x1xi32>
    %737 = vector.broadcast %736 : vector<2x6x1xi32> to vector<2x6x128xi32>
    %738 = arith.cmpi eq, %730, %737 : vector<2x6x128xi32>
    %739 = arith.extui %738 : vector<2x6x128xi1> to vector<2x6x128xi32>
    %740 = arith.sitofp %739 : vector<2x6x128xi32> to vector<2x6x128xf32>
    %741 = arith.mulf %727, %740 : vector<2x6x128xf32>
    %cst_53 = arith.constant dense<0xFF800000> : vector<2x6xf32>
    %742 = vector.multi_reduction <maximumf>, %741, %cst_53 [2] : vector<2x6x128xf32> to vector<2x6xf32>
    %743 = vector.shape_cast %742 : vector<2x6xf32> to vector<2x1x6xf32>
    %744 = vector.shape_cast %32 : vector<6x6xf32> to vector<1x6x6xf32>
    %745 = vector.broadcast %743 : vector<2x1x6xf32> to vector<2x6x6xf32>
    %746 = vector.broadcast %744 : vector<1x6x6xf32> to vector<2x6x6xf32>
    %747 = arith.mulf %745, %746 : vector<2x6x6xf32>
    %cst_54 = arith.constant dense<0xFF800000> : vector<2x6xf32>
    %748 = vector.multi_reduction <maximumf>, %747, %cst_54 [2] : vector<2x6x6xf32> to vector<2x6xf32>
    %749 = vector.shape_cast %729 : vector<2x6x1xf32> to vector<2x6xf32>
    %cst_55 = arith.constant 9.99999996E-13 : f32
    %750 = vector.broadcast %cst_55 : f32 to vector<2x6xf32>
    %751 = arith.addf %749, %750 : vector<2x6xf32>
    %752 = math.sqrt %751 : vector<2x6xf32>
    %cst_56 = arith.constant 1.000000e+00 : f32
    %753 = vector.broadcast %cst_56 : f32 to vector<2x6xf32>
    %754 = arith.cmpf ogt, %752, %753 : vector<2x6xf32>
    %cst_57 = arith.constant 1.000000e+00 : f32
    %755 = vector.broadcast %cst_57 : f32 to vector<2x6xf32>
    %756 = arith.subf %755, %752 : vector<2x6xf32>
    %cst_58 = arith.constant 0.000000e+00 : f32
    %757 = vector.broadcast %cst_58 : f32 to vector<2x6xf32>
    %758 = arith.select %754, %757, %756 : vector<2x6xi1>, vector<2x6xf32>
    %cst_59 = arith.constant 5.000000e-01 : f32
    %759 = vector.broadcast %cst_59 : f32 to vector<2x6xf32>
    %760 = arith.cmpf ogt, %748, %759 : vector<2x6xf32>
    %cst_60 = arith.constant 0.000000e+00 : f32
    %761 = vector.broadcast %cst_60 : f32 to vector<2x6xf32>
    %762 = arith.select %760, %761, %758 : vector<2x6xi1>, vector<2x6xf32>
    %c0_61 = arith.constant 0 : index
    %c0_62 = arith.constant 0 : index
    %763 = vector.load %arg3[%c0_61, %c0_62] : memref<2x6xf32, #tpu.memory_space<vmem>>, vector<2x6xf32>
    tpu.vector_store %arg3[%c0_61, %c0_62], %762 {strides = array<i32>} : memref<2x6xf32, #tpu.memory_space<vmem>>, vector<2x6xf32>,
    return
  }
}

</mosaic_0001>

<bundles_post_ra>
// kernel: tpu_custom_call.1
= control target key start
LH: loop header
LB: loop body
LE: loop exit
PB: predicated region body
PF: predicated region fallthrough
CT: control target
= control target key end

     0   :  { %8 = vsyncpa [#allocation3], 0  ;;  %s2910_s0 = inlined_call_operand.hbm [shape: f32[2,2,6], index: 0, kind: input, shape index: {}]   ;;  %s2911_s1 = inlined_call_operand.hbm [shape: f32[2,10,2,128], index: 1, kind: input, shape index: {}]   ;;  %s2912_s2 = inlined_call_operand.hbm [shape: f32[2,128], index: 2, kind: input, shape index: {}]   ;;  %s2913_s3 = inlined_call_operand.hbm [shape: f32[2,6], index: 3, kind: output, shape index: {}]  }
   0x1   :  { %9 = vsyncpa [#allocation6], 0 }
   0x2   :  { %10 = vsyncpa [#allocation4], 0  ;;  %s28_s14 = sshll.u32 %s2911_s1, 4  ;;  %s1595_s15 = smov [#allocation5]   ;;  %s29_s14 = int_to_ptr.hbm [resolvable:$true] %s28_s14 }
   0x3   :  { %s30_s16 = sshll.u32 %s1595_s15, 4  ;;  %s15_s19 = sshll.u32 %s2910_s0, 4  ;;  %s31_s16 = int_to_ptr.vmem [resolvable:$true] %s30_s16  ;;  %s16_s19 = int_to_ptr.hbm [resolvable:$true] %s15_s19 }
   0x4   :  { %s1596_s20 = smov 32   ;;  %s1597_s21 = smov 2  }
   0x5   :  { %36 = dma.hbm_to_vmem [thread:$0]  %s29_s14, 640, %s31_s16, [#allocation6], %s1596_s20, %s1596_s20, %s1597_s21  }
   0x6   :  { %s1598_s22 = smov [#allocation2]   ;;  %s42_s26 = sshll.u32 %s2912_s2, 4  ;;  %s43_s26 = int_to_ptr.hbm [resolvable:$true] %s42_s26 }
   0x7   :  { %s17_s23 = sshll.u32 %s1598_s22, 4  ;;  %s1599_s1 = smov [#allocation7]   ;;  %s18_s23 = int_to_ptr.vmem [resolvable:$true] %s17_s23 }
   0x8   :  { %23 = dma.hbm_to_vmem [thread:$0]  %s16_s19, 64, %s18_s23, [#allocation3], %s1596_s20, %s1596_s20, %s1597_s21  }
   0x9   :  { %s44_s27 = sshll.u32 %s1599_s1, 4  ;;  %s45_s27 = int_to_ptr.vmem [resolvable:$true] %s44_s27 }
   0xa   :  { %47 = dma.hbm_to_vmem [thread:$0]  %s43_s26, 32, %s45_s27, [#allocation6]  }
   0xb   :  { %1589 = dma.done.wait [#allocation3], 64  }
   0xc   :  { %1590 = vsyncadd [#allocation3], 4294967232 }
   0xd   :  { %1591 = dma.done.wait [#allocation6], 672  }
   0xe   :  { %1592 = vsyncadd [#allocation6], 4294966624  ;;  %v148_v0 = vlaneseq  ;;  %v1641_v3 = vld [vmem:[#allocation2 + $0x2] sm:$0x3]  ;;  %v2915_v4 = vmov 0.0   ;;  %vm3001_vm1 = vcmask 46080  }
   0xf   :  { %3011 = vst [vmem:[#allocation13_spill] sm:$0xff] %v1641_v3  ;;  %v1646_v6 = vld [vmem:[#allocation2] sm:$0x3]  ;;  %v1649_v7 = vperm.slane %v1641_v3, 0  ;;  %v171_v9 = vrot.slane %v1641_v3, 1  ;;  %vm3002_vm3 = vcmask 1045504  }
  0x10   :  { %v1632_v1 = vshrl.u32 %v148_v0, 7  ;;  %v1634_v2 = vand.u32 127, %v148_v0  ;;  %3013 = vst [vmem:[#allocation15_spill] sm:$0xff] %v1646_v6  ;;  %v1652_v8 = vperm.slane %v1646_v6, 0  ;;  %v156_v10 = vrot.slane %v1646_v6, 1  ;;  %s1602_s0 = smov [#allocation8]  }
  0x11   :  { %v173_v13 = vperm.slane %v171_v9, 0  ;;  %v2918_v21 = vperm.slane %v1646_v6, 1  ;;  %v65_v22 = vld [vmem:[#allocation5] sm:$0x3]  ;;  %v66_v23 = vld [vmem:[#allocation5 + $0x2] sm:$0x3] }
  0x12   :  { %3010 = vst [vmem:[#allocation12_spill] sm:$0xff] %v1634_v2  ;;  %vm152_vm0 = vcmp.le.s32.totalorder %v1634_v2, %v1632_v1  ;;  %1466 = vset.pattern.permute.xlu2 %v1632_v1  ;;  %1464 = vset.pattern.permute.xlu0 %v1632_v1  ;;  %v158_v14 = vperm.slane %v156_v10, 0  ;;  %v67_v24 = vld [vmem:[#allocation5 + $0x4] sm:$0x3]  ;;  %v68_v25 = vld [vmem:[#allocation5 + $0x6] sm:$0x3] }
  0x13   :  { %1465 = vset.pattern.permute.xlu1 %v1632_v1  ;;  %v1644_v5 = vsel %vm152_vm0, 1.0, %v2915_v4  ;;  %v69_v26 = vld [vmem:[#allocation5 + $0x8] sm:$0x3]  ;;  %v70_v27 = vld [vmem:[#allocation5 + $0xa] sm:$0x3]  ;;  %v75_v32 = vmul.f32 30.0, %v65_v22 }
  0x14   :  { %3012 = vst [vmem:[#allocation14_spill] sm:$0xff] %v1644_v5  ;;  %v176_v11 = vmul.f32 %v1644_v5, %v1649_v7  ;;  %v161_v12 = vmul.f32 %v1644_v5, %v1652_v8  ;;  %v177_v17 = vmul.f32 %v1644_v5, %v173_v13  ;;  %v162_v18 = vmul.f32 %v1644_v5, %v158_v14  ;;  %v71_v28 = vld [vmem:[#allocation5 + $0xc] sm:$0x3]  ;;  %v72_v29 = vld [vmem:[#allocation5 + $0xe] sm:$0x3]  ;;  %s1422_s2 = sshll.u32 %s1602_s0, 4  ;;  %s1423_s2 = int_to_ptr.vmem [resolvable:$true] %s1422_s2 }
  0x15   :  { %v73_v30 = vld [vmem:[#allocation5 + $0x10] sm:$0x3]  ;;  %v74_v31 = vld [vmem:[#allocation5 + $0x12] sm:$0x3]  ;;  %v76_v33 = vmul.f32 30.0, %v66_v23  ;;  %v77_v35 = vmul.f32 30.0, %v67_v24 }
  0x16   :  { %v178_v15 = vsel %vm3001_vm1, %v176_v11, 0.0  ;;  %v164_v16 = vsel %vm3001_vm1, %v161_v12, 0.0  ;;  %v181_v19 = vsel %vm3001_vm1, %v177_v17, 0.0  ;;  %v167_v20 = vsel %vm3001_vm1, %v162_v18, 0.0  ;;  %v1671_v34 = vld [vmem:[#allocation7] sm:$0x3] }
  0x17   :  { %179 = vadd.xlane.f32.xlu1 %v178_v15  ;;  %165 = vadd.xlane.f32.xlu0 %v164_v16  ;;  %v78_v36 = vmul.f32 30.0, %v68_v25  ;;  %v79_v37 = vmul.f32 30.0, %v69_v26  ;;  %v80_v38 = vmul.f32 30.0, %v70_v27  ;;  %v81_v39 = vmul.f32 30.0, %v71_v28  ;;  %v108_v51 = vld [vmem:[#allocation5 + $0x14] sm:$0x3] }
  0x18   :  { %v82_v40 = vmul.f32 30.0, %v72_v29  ;;  %v83_v41 = vmul.f32 30.0, %v73_v30  ;;  %v84_v42 = vmul.f32 30.0, %v74_v31  ;;  %v85_v43 = vadd.f32 -15.0, %v75_v32  ;;  %v109_v52 = vld [vmem:[#allocation5 + $0x16] sm:$0x3] }
  0x19   :  { %v86_v44 = vadd.f32 -15.0, %v76_v33  ;;  %vm64_vm2 = vcmp.lt.f32.partialorder %v1671_v34, 0.5  ;;  %v87_v45 = vadd.f32 -15.0, %v77_v35  ;;  %v88_v46 = vadd.f32 -15.0, %v78_v36  ;;  %v110_v53 = vld [vmem:[#allocation5 + $0x18] sm:$0x3] }
  0x1a   :  { %205 = vperm.xlu2 %1466, %v1649_v7   ;;  %v89_v47 = vadd.f32 -15.0, %v79_v37  ;;  %v90_v48 = vadd.f32 -15.0, %v80_v38  ;;  %v91_v49 = vadd.f32 -15.0, %v81_v39  ;;  %v92_v50 = vadd.f32 -15.0, %v82_v40  ;;  %v111_v54 = vld [vmem:[#allocation5 + $0x1a] sm:$0x3] }
  0x1b   :  { %v93_v55 = vadd.f32 -15.0, %v83_v41  ;;  %v94_v56 = vadd.f32 -15.0, %v84_v42  ;;  %v1676_v57 = vsel %vm64_vm2, 1000000.0, %v85_v43  ;;  %v1680_v58 = vsel %vm64_vm2, 1000000.0, %v86_v44 }
  0x1c   :  { %3014 = vst [vmem:[#allocation16_spill] sm:$0xff] %v1676_v57  ;;  %v1684_v59 = vsel %vm64_vm2, 1000000.0, %v87_v45  ;;  %v1688_v60 = vsel %vm64_vm2, 1000000.0, %v88_v46  ;;  %v118_v12 = vmul.f32 60.0, %v108_v51 }
  0x1d   :  { %3015 = vst [vmem:[#allocation17_spill] sm:$0xff] %v1680_v58  ;;  %v1692_v61 = vsel %vm64_vm2, 1000000.0, %v89_v47  ;;  %v112_v62 = vld [vmem:[#allocation5 + $0x1c] sm:$0x3]  ;;  %v119_v13 = vmul.f32 60.0, %v109_v52 }
  0x1e   :  { %3016 = vst [vmem:[#allocation18_spill] sm:$0xff] %v1684_v59  ;;  %v113_v63 = vld [vmem:[#allocation5 + $0x1e] sm:$0x3]  ;;  %v114_v0 = vld [vmem:[#allocation5 + $0x20] sm:$0x3]  ;;  %v120_v14 = vmul.f32 60.0, %v110_v53 }
  0x1f   :  { %182 = vadd.xlane.f32.xlu1 %v181_v19  ;;  %168 = vadd.xlane.f32.xlu0 %v167_v20  ;;  %v115_v9 = vld [vmem:[#allocation5 + $0x22] sm:$0x3]  ;;  %v116_v10 = vld [vmem:[#allocation5 + $0x24] sm:$0x3]  ;;  %v117_v11 = vld [vmem:[#allocation5 + $0x26] sm:$0x3] }
  0x20   :  { %v121_v15 = vmul.f32 60.0, %v111_v54  ;;  %v122_v16 = vmul.f32 60.0, %v112_v62  ;;  %v123_v17 = vmul.f32 60.0, %v113_v63  ;;  %v124_v18 = vmul.f32 60.0, %v114_v0  ;;  %s1424_s30 = sshll.u32 %s2913_s3, 4  ;;  %s1425_s30 = int_to_ptr.hbm [resolvable:$true] %s1424_s30 }
  0x21   :  { %v125_v19 = vmul.f32 60.0, %v115_v9  ;;  %v126_v20 = vmul.f32 60.0, %v116_v10  ;;  %v127_v22 = vmul.f32 60.0, %v117_v11  ;;  %v128_v23 = vadd.f32 -30.0, %v118_v12 }
  0x22   :  { %v129_v24 = vadd.f32 -30.0, %v119_v13  ;;  %v1696_v25 = vsel %vm64_vm2, 1000000.0, %v90_v48  ;;  %v130_v26 = vadd.f32 -30.0, %v120_v14  ;;  %v131_v27 = vadd.f32 -30.0, %v121_v15 }
  0x23   :  { %3017 = vst [vmem:[#allocation19_spill] sm:$0xff] %v1696_v25  ;;  %v132_v28 = vadd.f32 -30.0, %v122_v16  ;;  %v1700_v29 = vsel %vm64_vm2, 1000000.0, %v91_v49  ;;  %v133_v30 = vadd.f32 -30.0, %v123_v17  ;;  %v134_v31 = vadd.f32 -30.0, %v124_v18 }
  0x24   :  { %v135_v32 = vadd.f32 -30.0, %v125_v19  ;;  %v1704_v33 = vsel %vm64_vm2, 1000000.0, %v92_v50  ;;  %v1708_v35 = vsel %vm64_vm2, 1000000.0, %v93_v55  ;;  %v136_v36 = vadd.f32 -30.0, %v126_v20 }
  0x25   :  { %3018 = vst [vmem:[#allocation20_spill] sm:$0xff] %v1704_v33  ;;  %v137_v37 = vadd.f32 -30.0, %v127_v22  ;;  %v1712_v38 = vsel %vm64_vm2, 1000000.0, %v94_v56  ;;  %v1716_v39 = vsel %vm64_vm2, 1000000.0, %v128_v23 }
  0x26   :  { %3019 = vst [vmem:[#allocation21_spill] sm:$0xff] %v1712_v38  ;;  %v1720_v40 = vsel %vm64_vm2, 1000000.0, %v129_v24  ;;  %v1724_v41 = vsel %vm64_vm2, 1000000.0, %v130_v26  ;;  %v2921_v49 = vperm.slane %v1676_v57, 0 }
  0x27   :  { %3020 = vst [vmem:[#allocation22_spill] sm:$0xff] %v1716_v39  ;;  %v1728_v42 = vsel %vm64_vm2, 1000000.0, %v131_v27  ;;  %v1732_v43 = vsel %vm64_vm2, 1000000.0, %v132_v28  ;;  %v2922_v50 = vperm.slane %v1716_v39, 0 }
  0x28   :  { %3021 = vst [vmem:[#allocation23_spill] sm:$0xff] %v1720_v40  ;;  %v1736_v44 = vsel %vm64_vm2, 1000000.0, %v133_v30  ;;  %v1740_v45 = vsel %vm64_vm2, 1000000.0, %v134_v31  ;;  %v2923_v51 = vperm.slane %v1680_v58, 0 }
  0x29   :  { %3022 = vst [vmem:[#allocation24_spill] sm:$0xff] %v1724_v41  ;;  %v1744_v46 = vsel %vm64_vm2, 1000000.0, %v135_v32  ;;  %v1748_v47 = vsel %vm64_vm2, 1000000.0, %v136_v36  ;;  %v2924_v52 = vperm.slane %v1720_v40, 0 }
  0x2a   :  { %3023 = vst [vmem:[#allocation25_spill] sm:$0xff] %v1736_v44  ;;  %v1752_v48 = vsel %vm64_vm2, 1000000.0, %v137_v37  ;;  %v2928_v53 = vperm.slane %v1684_v59, 0  ;;  %v2933_v54 = vperm.slane %v1724_v41, 0  ;;  %v2936_v55 = vperm.slane %v1688_v60, 0 }
  0x2b   :  { %3024 = vst [vmem:[#allocation26_spill] sm:$0xff] %v1752_v48  ;;  %v2939_v56 = vperm.slane %v1728_v42, 0  ;;  %v2914_v12 = vrot.slane %v1676_v57, 1  ;;  %v2917_v13 = vrot.slane %v1716_v39, 1  ;;  %v1772_v14 = vrot.slane %v1680_v58, 1 }
  0x2c   :  { %v1775_v15 = vrot.slane %v1720_v40, 1  ;;  %v1778_v16 = vrot.slane %v1684_v59, 1  ;;  %v1781_v17 = vrot.slane %v1724_v41, 1  ;;  %v1786_v20 = vrot.slane %v1688_v60, 1 }
  0x2d   :  { %3025 = vst [vmem:[#allocation27_spill] sm:$0xff] %v1772_v14  ;;  %v1789_v22 = vrot.slane %v1728_v42, 1  ;;  %v1796_v27 = vperm.slane %v2914_v12, 0  ;;  %v1800_v28 = vperm.slane %v2917_v13, 0  ;;  %v1803_v30 = vrot.slane %v1692_v61, 1 }
  0x2e   :  { %3026 = vst [vmem:[#allocation28_spill] sm:$0xff] %v1775_v15  ;;  %v1806_v31 = vrot.slane %v1732_v43, 1  ;;  %v1809_v32 = vrot.slane %v1696_v25, 1  ;;  %v1818_v26 = vrot.slane %v1736_v44, 1  ;;  %v1821_v24 = vrot.slane %v1700_v29, 1 }
  0x2f   :  { %3027 = vst [vmem:[#allocation29_spill] sm:$0xff] %v1778_v16  ;;  %v1826_v37 = vrot.slane %v1740_v45, 1  ;;  %v1829_v12 = vrot.slane %v1704_v33, 1  ;;  %v1837_v19 = vrot.slane %v1744_v46, 1  ;;  %v1866_v0 = vrot.slane %v1708_v35, 1 }
  0x30   :  { %3028 = vst [vmem:[#allocation30_spill] sm:$0xff] %v1781_v17  ;;  %v1869_v36 = vrot.slane %v1748_v47, 1  ;;  %v3052_v58 = vperm.slane %v1748_v47, 0 }
  0x31   :  { %3029 = vst [vmem:[#allocation31_spill] sm:$0xff] %v1786_v20 }
  0x32   :  { %3030 = vst [vmem:[#allocation32_spill] sm:$0xff] %v1789_v22 }
  0x33   :  { %188 = vperm.xlu0 %1464, %v1652_v8   ;;  %3031 = vst [vmem:[#allocation33_spill] sm:$0xff] %v1796_v27 }
  0x34   :  { %3032 = vst [vmem:[#allocation34_spill] sm:$0xff] %v1800_v28 }
  0x35   :  { %3033 = vst [vmem:[#allocation35_spill] sm:$0xff] %v1803_v30 }
  0x36   :  { %3034 = vst [vmem:[#allocation36_spill] sm:$0xff] %v1806_v31 }
  0x37   :  { %3035 = vst [vmem:[#allocation37_spill] sm:$0xff] %v1809_v32 }
  0x38   :  { %195 = vperm.xlu1 %1465, %v2918_v21   ;;  %3036 = vst [vmem:[#allocation38_spill] sm:$0xff] %v1818_v26  ;;  %v2919_v21 = vmov 0  }
  0x39   :  { %3037 = vst [vmem:[#allocation39_spill] sm:$0xff] %v1821_v24 }
  0x3a   :  { %3038 = vst [vmem:[#allocation40_spill] sm:$0xff] %v1826_v37 }
  0x3b   :  { %3039 = vst [vmem:[#allocation41_spill] sm:$0xff] %v1829_v12  ;;  %1467 = vset.pattern.permute.xlu0 %v2919_v21 }
  0x3c   :  { %3040 = vst [vmem:[#allocation42_spill] sm:$0xff] %v1837_v19 }
  0x3d   :  { %3041 = vst [vmem:[#allocation43_spill] sm:$0xff] %v1866_v0 }
  0x3e   :  { %3042 = vst [vmem:[#allocation44_spill] sm:$0xff] %v1869_v36 }
  0x40   :  { %1468 = vset.pattern.permute.xlu1 %v2919_v21 }
  0x8a   :  { %v1858_v9 = vpop.xlane.xlu1 %179  ;;  %v1860_v13 = vpop.xlane.xlu0 %165 }
  0x8b   :  { %v253_v18 = vsub.f32 %v1860_v13, %v2921_v49  ;;  %v262_v10 = vsub.f32 %v1858_v9, %v2922_v50  ;;  %v279_v11 = vsub.f32 %v1860_v13, %v2923_v51  ;;  %v288_v4 = vsub.f32 %v1858_v9, %v2924_v52 }
  0x8c   :  { %v305_v21 = vsub.f32 %v1860_v13, %v2928_v53  ;;  %v314_v49 = vsub.f32 %v1858_v9, %v2933_v54  ;;  %v331_v50 = vsub.f32 %v1860_v13, %v2936_v55  ;;  %v340_v51 = vsub.f32 %v1858_v9, %v2939_v56 }
  0x8d   :  { %v264_v23 = vmul.f32 %v253_v18, %v253_v18  ;;  %v266_v63 = vmul.f32 %v262_v10, %v262_v10  ;;  %v290_v62 = vmul.f32 %v279_v11, %v279_v11  ;;  %v292_v52 = vmul.f32 %v288_v4, %v288_v4 }
  0x8e   :  { %v316_v34 = vmul.f32 %v305_v21, %v305_v21  ;;  %v318_v5 = vmul.f32 %v314_v49, %v314_v49  ;;  %v342_v6 = vmul.f32 %v331_v50, %v331_v50  ;;  %v344_v40 = vmul.f32 %v340_v51, %v340_v51 }
  0x8f   :  { %v268_v41 = vadd.f32 %v266_v63, %v264_v23  ;;  %v3043_v54 = vperm.slane %v1692_v61, 0  ;;  %v3044_v55 = vperm.slane %v1732_v43, 0  ;;  %v294_v56 = vadd.f32 %v292_v52, %v290_v62 }
  0x90   :  { %v320_v18 = vadd.f32 %v318_v5, %v316_v34  ;;  %v3045_v10 = vperm.slane %v1696_v25, 0  ;;  %v3046_v21 = vperm.slane %v1736_v44, 0  ;;  %v3047_v11 = vperm.slane %v1700_v29, 0 }
  0x91   :  { %v357_v39 = vsub.f32 %v1860_v13, %v3043_v54  ;;  %v366_v59 = vsub.f32 %v1858_v9, %v3044_v55  ;;  %v270_v50 = vmin.f32 %v268_v41, 1e+30  ;;  %v3048_v52 = vperm.slane %v1740_v45, 0 }
  0x92   :  { %v383_v4 = vsub.f32 %v1860_v13, %v3045_v10  ;;  %v392_v49 = vsub.f32 %v1858_v9, %v3046_v21  ;;  %v409_v54 = vsub.f32 %v1860_v13, %v3047_v11  ;;  %v3049_v55 = vperm.slane %v1704_v33, 0  ;;  %v1918_v62 = vpop.xlane.xlu0 %168  ;;  %v1926_v44 = vpop.xlane.xlu1 %182 }
  0x93   :  { %v368_v51 = vmul.f32 %v357_v39, %v357_v39  ;;  %v370_v63 = vmul.f32 %v366_v59, %v366_v59  ;;  %v418_v5 = vsub.f32 %v1858_v9, %v3048_v52  ;;  %v296_v10 = vmin.f32 %v270_v50, %v294_v56 }
  0x94   :  { %v394_v23 = vmul.f32 %v383_v4, %v383_v4  ;;  %v396_v53 = vmul.f32 %v392_v49, %v392_v49  ;;  %v435_v34 = vsub.f32 %v1860_v13, %v3049_v55  ;;  %v346_v41 = vadd.f32 %v344_v40, %v342_v6 }
  0x95   :  { %v420_v39 = vmul.f32 %v409_v54, %v409_v54  ;;  %v3050_v59 = vperm.slane %v1744_v46, 0  ;;  %v372_v11 = vadd.f32 %v370_v63, %v368_v51  ;;  %v422_v4 = vmul.f32 %v418_v5, %v418_v5 }
  0x96   :  { %v446_v49 = vmul.f32 %v435_v34, %v435_v34  ;;  %v3051_v25 = vperm.slane %v1708_v35, 0  ;;  %v322_v33 = vmin.f32 %v296_v10, %v320_v18  ;;  %v470_v6 = vsub.f32 %v1858_v9, %v3052_v58 }
  0x97   :  { %v444_v21 = vsub.f32 %v1858_v9, %v3050_v59  ;;  %v3053_v40 = vperm.slane %v1712_v38, 0  ;;  %v398_v50 = vadd.f32 %v396_v53, %v394_v23  ;;  %v3054_v63 = vperm.slane %v1752_v48, 0 }
  0x98   :  { %v461_v52 = vsub.f32 %v1860_v13, %v3051_v25  ;;  %v254_v25 = vsub.f32 %v1918_v62, %v1796_v27  ;;  %v348_v5 = vmin.f32 %v322_v33, %v346_v41  ;;  %v424_v18 = vadd.f32 %v422_v4, %v420_v39 }
  0x99   :  { %v448_v55 = vmul.f32 %v444_v21, %v444_v21  ;;  %v487_v56 = vsub.f32 %v1860_v13, %v3053_v40  ;;  %v496_v54 = vsub.f32 %v1858_v9, %v3054_v63  ;;  %v474_v10 = vmul.f32 %v470_v6, %v470_v6 }
  0x9a   :  { %v472_v51 = vmul.f32 %v461_v52, %v461_v52  ;;  %v263_v58 = vsub.f32 %v1926_v44, %v1800_v28  ;;  %v265_v21 = vmul.f32 %v254_v25, %v254_v25  ;;  %v3055_v40 = vperm.slane %v1772_v14, 0 }
  0x9b   :  { %v450_v34 = vadd.f32 %v448_v55, %v446_v49  ;;  %v498_v59 = vmul.f32 %v487_v56, %v487_v56  ;;  %v374_v23 = vmin.f32 %v348_v5, %v372_v11  ;;  %v500_v52 = vmul.f32 %v496_v54, %v496_v54 }
  0x9c   :  { %v280_v53 = vsub.f32 %v1918_v62, %v3055_v40  ;;  %v3056_v63 = vperm.slane %v1775_v15, 0  ;;  %v3057_v33 = vperm.slane %v1778_v16, 0  ;;  %v476_v39 = vadd.f32 %v474_v10, %v472_v51 }
  0x9d   :  { %v267_v4 = vmul.f32 %v263_v58, %v263_v58  ;;  %v3058_v55 = vperm.slane %v1781_v17, 0  ;;  %v400_v56 = vmin.f32 %v374_v23, %v398_v50  ;;  %v3059_v54 = vperm.slane %v1786_v20, 0 }
  0x9e   :  { %v289_v57 = vsub.f32 %v1926_v44, %v3056_v63  ;;  %v306_v41 = vsub.f32 %v1918_v62, %v3057_v33  ;;  %v291_v49 = vmul.f32 %v280_v53, %v280_v53  ;;  %v3060_v28 = vperm.slane %v1789_v22, 0 }
  0x9f   :  { %v315_v6 = vsub.f32 %v1926_v44, %v3058_v55  ;;  %v332_v5 = vsub.f32 %v1918_v62, %v3059_v54  ;;  %v269_v40 = vadd.f32 %v267_v4, %v265_v21  ;;  %v3061_v10 = vperm.slane %v1803_v30, 0 }
  0xa0   :  { %v293_v25 = vmul.f32 %v289_v57, %v289_v57  ;;  %v317_v11 = vmul.f32 %v306_v41, %v306_v41  ;;  %v341_v51 = vsub.f32 %v1926_v44, %v3060_v28  ;;  %v426_v53 = vmin.f32 %v400_v56, %v424_v18 }
  0xa1   :  { %v319_v63 = vmul.f32 %v315_v6, %v315_v6  ;;  %v358_v58 = vsub.f32 %v1918_v62, %v3061_v10  ;;  %v502_v33 = vadd.f32 %v500_v52, %v498_v59  ;;  %v343_v55 = vmul.f32 %v332_v5, %v332_v5 }
  0xa2   :  { %v3062_v57 = vperm.slane %v1806_v31, 0  ;;  %v271_v23 = vmin.f32 %v269_v40, 1e+30  ;;  %v295_v41 = vadd.f32 %v293_v25, %v291_v49  ;;  %v345_v54 = vmul.f32 %v341_v51, %v341_v51  ;;  %v3105_v31 = vld [vmem:[#allocation24_spill] sm:$0xff] }
  0xa3   :  { %v369_v21 = vmul.f32 %v358_v58, %v358_v58  ;;  %v452_v4 = vmin.f32 %v426_v53, %v450_v34  ;;  %v3063_v27 = vperm.slane %v1809_v32, 0  ;;  %v3064_v30 = vperm.slane %v1818_v26, 0 }
  0xa4   :  { %v367_v50 = vsub.f32 %v1926_v44, %v3062_v57  ;;  %v297_v59 = vmin.f32 %v271_v23, %v295_v41  ;;  %v321_v52 = vadd.f32 %v319_v63, %v317_v11  ;;  %v3065_v56 = vperm.slane %v1821_v24, 0 }
  0xa5   :  { %v384_v28 = vsub.f32 %v1918_v62, %v3063_v27  ;;  %v393_v18 = vsub.f32 %v1926_v44, %v3064_v30  ;;  %v3066_v49 = vperm.slane %v1826_v37, 0  ;;  %v478_v34 = vmin.f32 %v452_v4, %v476_v39 }
  0xa6   :  { %v371_v6 = vmul.f32 %v367_v50, %v367_v50  ;;  %v410_v5 = vsub.f32 %v1918_v62, %v3065_v56  ;;  %v347_v40 = vadd.f32 %v345_v54, %v343_v55  ;;  %v323_v58 = vmin.f32 %v297_v59, %v321_v52 }
  0xa7   :  { %v419_v25 = vsub.f32 %v1926_v44, %v3066_v49  ;;  %v395_v51 = vmul.f32 %v384_v28, %v384_v28  ;;  %v397_v10 = vmul.f32 %v393_v18, %v393_v18  ;;  %v3067_v57 = vperm.slane %v1829_v12, 0 }
  0xa8   :  { %v373_v27 = vadd.f32 %v371_v6, %v369_v21  ;;  %v421_v53 = vmul.f32 %v410_v5, %v410_v5  ;;  %v1980_v11 = vmin.f32 %v478_v34, %v502_v33  ;;  %v3068_v50 = vperm.slane %v1837_v19, 0  ;;  %v189_v21 = vpop.permute.xlu0 %188 }
  0xa9   :  { %v436_v30 = vsub.f32 %v1918_v62, %v3067_v57  ;;  %v423_v63 = vmul.f32 %v419_v25, %v419_v25  ;;  %v2955_v41 = vperm.slane %v1866_v0, 0  ;;  %v349_v39 = vmin.f32 %v323_v58, %v347_v40 }
  0xaa   :  { %v445_v23 = vsub.f32 %v1926_v44, %v3068_v50  ;;  %v399_v55 = vadd.f32 %v397_v10, %v395_v51  ;;  %v2954_v4 = vperm.slane %v1869_v36, 0  ;;  %v1175_v6 = vsel %vm3002_vm3, %v1980_v11, inf  ;;  %v196_v50 = vpop.permute.xlu1 %195 }
  0xab   :  { %v447_v54 = vmul.f32 %v436_v30, %v436_v30  ;;  %v462_v33 = vsub.f32 %v1918_v62, %v2955_v41  ;;  %v3069_v18 = vrot.slane %v1712_v38, 1  ;;  %v199_v52 = vsub.f32 %v1860_v13, %v189_v21  ;;  %1176 = vmin.xlane.f32.xlu2 %v1175_v6 }
  0xac   :  { %v449_v28 = vmul.f32 %v445_v23, %v445_v23  ;;  %v375_v56 = vmin.f32 %v349_v39, %v373_v27  ;;  %v471_v5 = vsub.f32 %v1926_v44, %v2954_v4  ;;  %v2956_v49 = vrot.slane %v1752_v48, 1 }
  0xad   :  { %v484_v59 = vperm.slane %v3069_v18, 0  ;;  %v425_v25 = vadd.f32 %v423_v63, %v421_v53  ;;  %530 = vperm.xlu0 %1467, %v199_v52   ;;  %v473_v51 = vmul.f32 %v462_v33, %v462_v33  ;;  %v200_v53 = vsub.f32 %v1918_v62, %v196_v50  ;;  %v206_v33 = vpop.permute.xlu2 %205 }
  0xae   :  { %v401_v40 = vmin.f32 %v375_v56, %v399_v55  ;;  %v475_v10 = vmul.f32 %v471_v5, %v471_v5  ;;  %v493_v58 = vperm.slane %v2956_v49, 0  ;;  %v451_v13 = vadd.f32 %v449_v28, %v447_v54 }
  0xaf   :  { %v488_v34 = vsub.f32 %v1918_v62, %v484_v59  ;;  %v216_v59 = vsub.f32 %v1858_v9, %v206_v33  ;;  %v2957_v54 = vperm.slane %v1641_v3, 1  ;;  %v744_v9 = vsub.f32 %v1732_v43, %v1728_v42 }
  0xb0   :  { %v427_v57 = vmin.f32 %v401_v40, %v425_v25  ;;  %v497_v27 = vsub.f32 %v1926_v44, %v493_v58  ;;  %v477_v39 = vadd.f32 %v475_v10, %v473_v51  ;;  %v3073_v5 = vsub.f32 %v1744_v46, %v1740_v45 }
  0xb1   :  { %v499_v30 = vmul.f32 %v488_v34, %v488_v34  ;;  %v3075_v34 = vperm.slane %v1700_v29, 0  ;;  %v3076_v51 = vperm.slane %v1688_v60, 0  ;;  %v3078_v50 = vsub.f32 %v1752_v48, %v1748_v47 }
  0xb2   :  { %v453_v23 = vmin.f32 %v427_v57, %v451_v13  ;;  %v501_v21 = vmul.f32 %v497_v27, %v497_v27  ;;  %v2027_v25 = vperm.slane %v3073_v5, 0  ;;  %v2043_v57 = vperm.slane %v744_v9, 0  ;;  %v3085_v5 = vld [vmem:[#allocation18_spill] sm:$0xff] }
  0xb3   :  { %v3077_v13 = vsub.f32 %v1748_v47, %v1744_v46  ;;  %v3089_v41 = vperm.slane %v1728_v42, 0  ;;  %v672_v48 = vsub.f32 %v1728_v42, %v3105_v31 }
  0xb4   :  { %v479_v63 = vmin.f32 %v453_v23, %v477_v39  ;;  %v503_v6 = vadd.f32 %v501_v21, %v499_v30  ;;  %v742_v30 = vsub.f32 %v1692_v61, %v1688_v60  ;;  %v2055_v23 = vperm.slane %v3078_v50, 0 }
  0xb5   :  { %535 = vperm.xlu0 %1467, %v200_v53   ;;  %v2048_v27 = vperm.slane %v3077_v13, 0  ;;  %v3079_v39 = vsub.f32 %v1712_v38, %v1708_v35  ;;  %v3086_v13 = vld [vmem:[#allocation25_spill] sm:$0xff] }
  0xb6   :  { %v505_v18 = vmin.f32 %v479_v63, %v503_v6  ;;  %v3081_v6 = vld [vmem:[#allocation16_spill] sm:$0xff]  ;;  %v3091_v12 = vsub.f32 %v1740_v45, %v3086_v13 }
  0xb7   :  { %v2060_v21 = vperm.slane %v3079_v39, 0  ;;  %v3088_v39 = vperm.slane %v1708_v35, 0 }
  0xb8   :  { %v1178_v55 = vsel %vm3002_vm3, %v505_v18, inf  ;;  %v2105_v24 = vperm.slane %v3091_v12, 0 }
  0xb9   :  { %1179 = vmin.xlane.f32.xlu2 %v1178_v55 }
  0xbd   :  { %542 = vperm.xlu0 %1467, %v216_v59   ;;  %v3083_v59 = vld [vmem:[#allocation20_spill] sm:$0xff] }
  0xbe   :  { %v3084_v9 = vperm.slane %v3083_v59, 0 }
  0xc5   :  { %1469 = vset.pattern.permute.xlu0 %v1632_v1 }
  0xcd   :  { %223 = vperm.xlu0 %1469, %v1652_v8  }
  0xd1   :  { %212 = vperm.xlu2 %1466, %v2957_v54   ;;  %v3090_v54 = vperm.slane %v1692_v61, 0 }
  0xd5   :  { %237 = vperm.xlu0 %1469, %v1649_v7  }
 0x11e   :  { %v2014_v28 = vpop.xlane.xlu2 %1176 }
 0x11f   :  { %v2012_v62 = vpop.permute.xlu0 %530  ;;  %3070 = vst [vmem:[#allocation45_spill] sm:$0xff] %v2014_v28  ;;  %vm1181_vm5 = vcmp.eq.f32.partialorder %v1980_v11, %v2014_v28  ;;  %v676_v11 = vperm.slane %v672_v48, 0 }
 0x120   :  { %v2035_v40 = vsub.f32 %v3075_v34, %v2012_v62  ;;  %v2040_v10 = vsub.f32 %v3076_v51, %v2012_v62  ;;  %v670_v51 = vsub.f32 %v1688_v60, %v3085_v5  ;;  %v2085_v4 = vsub.f32 %v3088_v39, %v2012_v62 }
 0x122   :  { %v984_v33 = vmul.f32 %v2035_v40, %v2027_v25  ;;  %v768_v60 = vmul.f32 %v2040_v10, %v2043_v57  ;;  %v1128_v16 = vmul.f32 %v2085_v4, %v2055_v23 }
 0x127   :  { %v2016_v52 = vpop.permute.xlu0 %535 }
 0x128   :  { %3071 = vst [vmem:[#allocation46_spill] sm:$0xff] %v2016_v52 }
 0x12c   :  { %v2020_v56 = vpop.xlane.xlu2 %1179 }
 0x12d   :  { %3072 = vst [vmem:[#allocation47_spill] sm:$0xff] %v2020_v56  ;;  %vm1182_vm4 = vcmp.eq.f32.partialorder %v505_v18, %v2020_v56  ;;  %v3082_v18 = vld [vmem:[#allocation17_spill] sm:$0xff] }
 0x12e   :  { %v1184_v8 = vsel %vm1182_vm4, %v1634_v2, 128  ;;  %v506_v55 = vsub.f32 %v3082_v18, %v3081_v6  ;;  %v598_v34 = vsub.f32 %v3085_v5, %v3082_v18 }
 0x12f   :  { %v2030_v7 = vsel %vm3002_vm3, %v1184_v8, 2147483647  ;;  %v543_v53 = vpop.permute.xlu0 %542  ;;  %v2071_v8 = vsub.f32 %v3084_v9, %v2012_v62 }
 0x130   :  { %3074 = vst [vmem:[#allocation48_spill] sm:$0xff] %v2030_v7  ;;  %v1202_v58 = vshra.s32 %v2030_v7, 16  ;;  %v2090_v49 = vsub.f32 %v3089_v41, %v543_v53  ;;  %v3092_v41 = vld [vmem:[#allocation19_spill] sm:$0xff]  ;;  %v520_v36 = vperm.slane %v506_v55, 0 }
 0x131   :  { %v1056_v56 = vmul.f32 %v2071_v8, %v2048_v27  ;;  %v3093_v32 = vperm.slane %v3092_v41, 0  ;;  %v3094_v14 = vsub.f32 %v3092_v41, %v1692_v61  ;;  %v3096_v12 = vsub.f32 %v1700_v29, %v3092_v41 }
 0x132   :  { %v2062_v63 = vcvt.s32.f32 %v1202_v58  ;;  %v3087_v58 = vsub.f32 %v3086_v13, %v1732_v43 }
 0x133   :  { %v2110_v20 = vsub.f32 %v3093_v32, %v2012_v62  ;;  %v2119_v19 = vperm.slane %v3094_v14, 0  ;;  %v2128_v37 = vperm.slane %v3096_v12, 0  ;;  %v3097_v32 = vperm.slane %v3086_v13, 0 }
 0x134   :  { %3080 = vst [vmem:[#allocation49_spill] sm:$0xff] %v2062_v63  ;;  %v2080_v50 = vperm.slane %v3087_v58, 0  ;;  %1205 = vmin.xlane.f32.xlu2 %v2062_v63  ;;  %v213_v9 = vpop.permute.xlu2 %212  ;;  %v2097_v58 = vsub.f32 %v3090_v54, %v2012_v62  ;;  %v2114_v54 = vperm.slane %v742_v30, 0  ;;  %v3098_v30 = vsub.f32 %v3083_v59, %v1700_v29 }
 0x135   :  { %v217_v39 = vsub.f32 %v1926_v44, %v213_v9  ;;  %v3095_v44 = vperm.slane %v1732_v43, 0  ;;  %v2132_v26 = vsub.f32 %v3097_v32, %v543_v53  ;;  %v3099_v14 = vperm.slane %v1740_v45, 0 }
 0x136   :  { %v2137_v61 = vperm.slane %v3098_v30, 0  ;;  %v3101_v12 = vperm.slane %v1744_v46, 0  ;;  %v3102_v32 = vperm.slane %v1748_v47, 0  ;;  %v840_v30 = vmul.f32 %v2097_v58, %v2080_v50  ;;  %v3104_v46 = vld [vmem:[#allocation23_spill] sm:$0xff] }
 0x137   :  { %v2123_v9 = vsub.f32 %v3095_v44, %v543_v53  ;;  %547 = vperm.xlu1 %1468, %v217_v39   ;;  %v2141_v43 = vsub.f32 %v3099_v14, %v543_v53  ;;  %v3100_v44 = vsub.f32 %v1708_v35, %v3083_v59  ;;  %v770_v39 = vmul.f32 %v2090_v49, %v2114_v54 }
 0x138   :  { %v2154_v29 = vsub.f32 %v3101_v12, %v543_v53  ;;  %v2158_v45 = vsub.f32 %v3102_v32, %v543_v53  ;;  %v912_v35 = vmul.f32 %v2110_v20, %v2105_v24  ;;  %v914_v59 = vmul.f32 %v2132_v26, %v2128_v37 }
 0x139   :  { %v2146_v41 = vperm.slane %v3100_v44, 0  ;;  %v842_v13 = vmul.f32 %v2123_v9, %v2119_v19  ;;  %v986_v14 = vmul.f32 %v2141_v43, %v2137_v61  ;;  %v3103_v44 = vld [vmem:[#allocation22_spill] sm:$0xff]  ;;  %v600_v47 = vsub.f32 %v3105_v31, %v3104_v46 }
 0x13a   :  { %v508_v12 = vsub.f32 %v3104_v46, %v3103_v44  ;;  %v2172_v32 = vsub.f32 %v768_v60, %v770_v39  ;;  %v2176_v17 = vsub.f32 %v912_v35, %v914_v59  ;;  %v1130_v38 = vmul.f32 %v2158_v45, %v2060_v21 }
 0x13b   :  { %v2174_v22 = vsub.f32 %v840_v30, %v842_v13  ;;  %v2178_v15 = vsub.f32 %v984_v33, %v986_v14  ;;  %v1058_v52 = vmul.f32 %v2154_v29, %v2146_v41  ;;  %v612_v60 = vperm.slane %v598_v34, 0 }
 0x13c   :  { %v684_v39 = vperm.slane %v670_v51, 0  ;;  %v3106_v33 = vperm.slane %v3103_v44, 0  ;;  %v3107_v35 = vperm.slane %v3104_v46, 0  ;;  %v3108_v14 = vperm.slane %v3105_v31, 0 }
 0x13d   :  { %v2188_v13 = vsub.f32 %v1056_v56, %v1058_v52  ;;  %v2196_v55 = vsub.f32 %v1128_v16, %v1130_v38  ;;  %v512_v0 = vperm.slane %v508_v12, 0  ;;  %v604_v63 = vperm.slane %v600_v47, 0 }
 0x13e   :  { %v550_v30 = vsub.f32 %v3106_v33, %v543_v53  ;;  %v622_v59 = vsub.f32 %v3107_v35, %v543_v53  ;;  %v694_v42 = vsub.f32 %v3108_v14, %v543_v53  ;;  %v3109_v52 = vperm.slane %v3081_v6, 0 }
 0x13f   :  { %1470 = vset.pattern.permute.xlu1 %v1632_v1  ;;  %v3110_v34 = vperm.slane %v3082_v18, 0  ;;  %v3111_v46 = vperm.slane %v3085_v5, 0  ;;  %v1183_v38 = vsel %vm1181_vm5, %v1634_v2, 128  ;;  %v2209_v16 = vpop.permute.xlu0 %223 }
 0x140   :  { %v538_v56 = vsub.f32 %v3109_v52, %v2012_v62  ;;  %v554_v53 = vmul.f32 %v550_v30, %v520_v36  ;;  %v626_v12 = vmul.f32 %v622_v59, %v612_v60  ;;  %v698_v1 = vmul.f32 %v694_v42, %v684_v39 }
 0x141   :  { %v620_v51 = vsub.f32 %v3110_v34, %v2012_v62  ;;  %v692_v31 = vsub.f32 %v3111_v46, %v2012_v62  ;;  %v2212_v35 = vsel %vm3002_vm3, %v1183_v38, 2147483647  ;;  %v776_v6 = vmul.f32 %v2090_v49, %v2209_v16 }
 0x142   :  { %v552_v48 = vmul.f32 %v538_v56, %v512_v0  ;;  %3112 = vst [vmem:[#allocation17_spill] sm:$0xff] %v2212_v35  ;;  %v1187_v5 = vshra.s32 %v2212_v35, 16  ;;  %v2236_v44 = vmul.f32 %v2123_v9, %v2209_v16 }
 0x143   :  { %v624_v47 = vmul.f32 %v620_v51, %v604_v63  ;;  %v696_v33 = vmul.f32 %v692_v31, %v676_v11 }
 0x144   :  { %v556_v14 = vsub.f32 %v552_v48, %v554_v53  ;;  %v2220_v2 = vcvt.s32.f32 %v1187_v5  ;;  %v3113_v53 = vld [vmem:[#allocation15_spill] sm:$0xff]  ;;  %v632_v48 = vmul.f32 %v622_v59, %v2209_v16  ;;  %v704_v5 = vmul.f32 %v694_v42, %v2209_v16 }
 0x145   :  { %v628_v18 = vsub.f32 %v624_v47, %v626_v12  ;;  %v2214_v52 = vsub.f32 %v696_v33, %v698_v1  ;;  %v3114_v12 = vperm.slane %v3113_v53, 1  ;;  %v560_v1 = vmul.f32 %v550_v30, %v2209_v16 }
 0x146   :  { %v574_v62 = vand.u32 2147483647, %v556_v14  ;;  %v2240_v53 = vmul.f32 %v2132_v26, %v2209_v16  ;;  %v516_v30 = vmul.f32 %v512_v0, %v2209_v16  ;;  %v608_v33 = vmul.f32 %v604_v63, %v2209_v16 }
 0x147   :  { %v646_v34 = vand.u32 2147483647, %v628_v18  ;;  %v2218_v28 = vpop.permute.xlu0 %237  ;;  %v680_v47 = vmul.f32 %v676_v11, %v2209_v16  ;;  %v2253_v0 = vmul.f32 %v2141_v43, %v2209_v16  ;;  %v752_v63 = vmul.f32 %v2043_v57, %v2209_v16 }
 0x148   :  { %v524_v59 = vmul.f32 %v520_v36, %v2218_v28  ;;  %v616_v42 = vmul.f32 %v612_v60, %v2218_v28  ;;  %v630_v49 = vmul.f32 %v620_v51, %v2218_v28  ;;  %v688_v9 = vmul.f32 %v684_v39, %v2218_v28 }
 0x149   :  { %v702_v26 = vmul.f32 %v692_v31, %v2218_v28  ;;  %v760_v31 = vmul.f32 %v2114_v54, %v2218_v28  ;;  %v2265_v57 = vmul.f32 %v2154_v29, %v2209_v16 }
 0x14a   :  { %v526_v38 = vsub.f32 %v516_v30, %v524_v59  ;;  %v618_v36 = vsub.f32 %v608_v33, %v616_v42  ;;  %v690_v35 = vsub.f32 %v680_v47, %v688_v9  ;;  %v3122_v33 = vand.u32 2147483647, %v2214_v52 }
 0x14b   :  { %v706_v54 = vsub.f32 %v702_v26, %v704_v5  ;;  %v846_v26 = vmul.f32 %v2097_v58, %v2218_v28  ;;  %v1112_v42 = vmul.f32 %v2055_v23, %v2209_v16  ;;  %v3143_v23 = vand.u32 2147483647, %v2188_v13 }
 0x14c   :  { %230 = vperm.xlu2 %1466, %v3114_v12   ;;  %v558_v12 = vmul.f32 %v538_v56, %v2218_v28  ;;  %v634_v56 = vsub.f32 %v630_v49, %v632_v48  ;;  %v564_v60 = vand.u32 2147483647, %v526_v38  ;;  %v568_v51 = vmul.f32 %v556_v14, %v526_v38 }
 0x14d   :  { %v636_v3 = vand.u32 2147483647, %v618_v36  ;;  %v640_v39 = vmul.f32 %v628_v18, %v618_v36  ;;  %vm566_vm6 = vcmp.ne.f32.partialorder %v526_v38, 0.0  ;;  %vm638_vm12 = vcmp.ne.f32.partialorder %v618_v36, 0.0 }
 0x14e   :  { %v562_v46 = vsub.f32 %v558_v12, %v560_v1  ;;  %v652_v30 = vmul.f32 %v634_v56, %v618_v36  ;;  %vm570_vm7 = vcmp.ge.f32.partialorder %v568_v51, 0.0  ;;  %vm576_vm8 = vcmp.le.f32.partialorder %v574_v62, %v564_v60 }
 0x14f   :  { %v658_v43 = vand.u32 2147483647, %v634_v56  ;;  %vm572_vm9 = vmand %vm566_vm6, %vm570_vm7  ;;  %vm642_vm14 = vcmp.ge.f32.partialorder %v640_v39, 0.0  ;;  %vm2267_vm15 = vcmp.le.f32.partialorder %v646_v34, %v636_v3  ;;  %v708_v18 = vand.u32 2147483647, %v690_v35 }
 0x150   :  { %v580_v7 = vmul.f32 %v562_v46, %v526_v38  ;;  %v586_v11 = vand.u32 2147483647, %v562_v46  ;;  %vm578_vm13 = vmand %vm572_vm9, %vm576_vm8  ;;  %vm654_vm2 = vcmp.ge.f32.partialorder %v652_v30, 0.0  ;;  %v762_v62 = vsub.f32 %v752_v63, %v760_v31 }
 0x151   :  { %v774_v46 = vmul.f32 %v2040_v10, %v2218_v28  ;;  %vm2276_vm5 = vcmp.le.f32.partialorder %v658_v43, %v636_v3  ;;  %vm710_vm6 = vcmp.ne.f32.partialorder %v690_v35, 0.0  ;;  %v724_v34 = vmul.f32 %v706_v54, %v690_v35  ;;  %vm644_vm7 = vmand %vm638_vm12, %vm642_vm14 }
 0x152   :  { %vm582_vm10 = vcmp.ge.f32.partialorder %v580_v7, 0.0  ;;  %vm2259_vm11 = vcmp.le.f32.partialorder %v586_v11, %v564_v60  ;;  %v712_v7 = vmul.f32 %v2214_v52, %v690_v35  ;;  %v730_v38 = vand.u32 2147483647, %v706_v54  ;;  %vm650_vm9 = vmand %vm644_vm7, %vm2267_vm15  ;;  %v3157_v54 = vld [vmem:[#allocation21_spill] sm:$0xff] }
 0x153   :  { %vm584_vm0 = vmand %vm578_vm13, %vm582_vm10  ;;  %v3121_v48 = vmov 0.0   ;;  %vm2285_vm8 = vcmp.le.f32.partialorder %v3122_v33, %v708_v18  ;;  %v778_v10 = vsub.f32 %v774_v46, %v776_v6  ;;  %v780_v59 = vand.u32 2147483647, %v762_v62 }
 0x154   :  { %vm590_vm4 = vmand %vm584_vm0, %vm2259_vm11  ;;  %vm714_vm10 = vcmp.ge.f32.partialorder %v712_v7, 0.0  ;;  %vm726_vm11 = vcmp.ge.f32.partialorder %v724_v34, 0.0  ;;  %v824_v12 = vmul.f32 %v2080_v50, %v2209_v16  ;;  %vm2294_vm12 = vcmp.le.f32.partialorder %v730_v38, %v708_v18 }
 0x155   :  { %v1436_v47 = vsel %vm590_vm4, 1.0, %v3121_v48  ;;  %vm656_vm13 = vmand %vm650_vm9, %vm654_vm2  ;;  %v784_v52 = vmul.f32 %v2172_v32, %v762_v62  ;;  %v3127_v6 = vand.u32 2147483647, %v2172_v32  ;;  %v796_v9 = vmul.f32 %v778_v10, %v762_v62 }
 0x156   :  { %v596_v3 = vmax.f32 %v1436_v47, 0.0  ;;  %vm662_vm15 = vmand %vm656_vm13, %vm2276_vm5  ;;  %v832_v50 = vmul.f32 %v2119_v19, %v2218_v28  ;;  %v896_v36 = vmul.f32 %v2105_v24, %v2209_v16  ;;  %v904_v32 = vmul.f32 %v2128_v37, %v2218_v28 }
 0x157   :  { %vm2301_vm14 = vcmp.le.f32.partialorder %v3127_v6, %v780_v59  ;;  %v1438_v56 = vsel %vm662_vm15, 1.0, %v3121_v48  ;;  %vm716_vm0 = vmand %vm710_vm6, %vm714_vm10  ;;  %vm782_vm2 = vcmp.ne.f32.partialorder %v762_v62, 0.0  ;;  %vm786_vm4 = vcmp.ge.f32.partialorder %v784_v52, 0.0 }
 0x158   :  { %v802_v63 = vand.u32 2147483647, %v778_v10  ;;  %v668_v60 = vmax.f32 %v596_v3, %v1438_v56  ;;  %vm722_vm5 = vmand %vm716_vm0, %vm2285_vm8  ;;  %v834_v19 = vsub.f32 %v824_v12, %v832_v50  ;;  %v850_v58 = vsub.f32 %v846_v26, %v2236_v44 }
 0x159   :  { %v2320_v51 = vsub.f32 %v896_v36, %v904_v32  ;;  %vm728_vm7 = vmand %vm722_vm5, %vm726_vm11  ;;  %vm798_vm9 = vcmp.ge.f32.partialorder %v796_v9, 0.0  ;;  %v918_v24 = vmul.f32 %v2110_v20, %v2218_v28  ;;  %v968_v37 = vmul.f32 %v2027_v25, %v2209_v16 }
 0x15a   :  { %v976_v35 = vmul.f32 %v2137_v61, %v2218_v28  ;;  %vm734_vm6 = vmand %vm728_vm7, %vm2294_vm12  ;;  %v852_v11 = vand.u32 2147483647, %v834_v19  ;;  %v856_v44 = vmul.f32 %v2174_v22, %v834_v19  ;;  %v868_v39 = vmul.f32 %v850_v58, %v834_v19 }
 0x15b   :  { %v990_v30 = vmul.f32 %v2035_v40, %v2218_v28  ;;  %v1440_v20 = vsel %vm734_vm6, 1.0, %v3121_v48  ;;  %vm788_vm8 = vmand %vm782_vm2, %vm786_vm4  ;;  %v874_v25 = vand.u32 2147483647, %v850_v58  ;;  %v922_v61 = vsub.f32 %v918_v24, %v2240_v53 }
 0x15c   :  { %v924_v31 = vand.u32 2147483647, %v2320_v51  ;;  %v740_v43 = vmax.f32 %v668_v60, %v1440_v20  ;;  %vm794_vm10 = vmand %vm788_vm8, %vm2301_vm14  ;;  %vm854_vm11 = vcmp.ne.f32.partialorder %v834_v19, 0.0  ;;  %vm858_vm13 = vcmp.ge.f32.partialorder %v856_v44, 0.0  ;;  %v3152_v44 = vld [vmem:[#allocation14_spill] sm:$0xff]  ;;  %v3153_v20 = vld [vmem:[#allocation48_spill] sm:$0xff] }
 0x15d   :  { %v3130_v40 = vand.u32 2147483647, %v2174_v22  ;;  %vm800_vm15 = vmand %vm794_vm10, %vm798_vm9  ;;  %vm804_vm0 = vcmp.le.f32.partialorder %v802_v63, %v780_v59  ;;  %v928_v53 = vmul.f32 %v2176_v17, %v2320_v51  ;;  %v3133_v14 = vand.u32 2147483647, %v2176_v17 }
 0x15e   :  { %v1136_v18 = vmul.f32 %v2158_v45, %v2209_v16  ;;  %vm806_vm14 = vmand %vm800_vm15, %vm804_vm0  ;;  %vm870_vm4 = vcmp.ge.f32.partialorder %v868_v39, 0.0  ;;  %v940_v22 = vmul.f32 %v922_v61, %v2320_v51  ;;  %v978_v7 = vsub.f32 %v968_v37, %v976_v35  ;;  %v3150_v37 = vld [vmem:[#allocation13_spill] sm:$0xff] }
 0x15f   :  { %vm2344_vm12 = vcmp.le.f32.partialorder %v3130_v40, %v852_v11  ;;  %vm2353_vm2 = vcmp.le.f32.partialorder %v3133_v14, %v924_v31  ;;  %v994_v62 = vsub.f32 %v990_v30, %v2253_v0  ;;  %v1442_v46 = vsel %vm806_vm14, 1.0, %v3121_v48  ;;  %vm860_vm5 = vmand %vm854_vm11, %vm858_vm13  ;;  %v3154_v40 = vld [vmem:[#allocation49_spill] sm:$0xff]  ;;  %v3156_v14 = vld [vmem:[#allocation43_spill] sm:$0xff] }
 0x160   :  { %vm2362_vm7 = vcmp.le.f32.partialorder %v874_v25, %v852_v11  ;;  %v1040_v17 = vmul.f32 %v2048_v27, %v2209_v16  ;;  %v1048_v45 = vmul.f32 %v2146_v41, %v2218_v28  ;;  %v812_v34 = vmax.f32 %v740_v43, %v1442_v46  ;;  %vm866_vm9 = vmand %vm860_vm5, %vm2344_vm12 }
 0x161   :  { %1190 = vmin.xlane.f32.xlu1 %v2220_v2  ;;  %vm926_vm6 = vcmp.ne.f32.partialorder %v2320_v51, 0.0  ;;  %vm930_vm8 = vcmp.ge.f32.partialorder %v928_v53, 0.0  ;;  %v996_v0 = vand.u32 2147483647, %v978_v7  ;;  %vm872_vm10 = vmand %vm866_vm9, %vm870_vm4  ;;  %v946_v38 = vand.u32 2147483647, %v922_v61 }
 0x162   :  { %v1000_v47 = vmul.f32 %v2178_v15, %v978_v7  ;;  %v1012_v33 = vmul.f32 %v994_v62, %v978_v7  ;;  %v1018_v5 = vand.u32 2147483647, %v994_v62  ;;  %vm878_vm11 = vmand %vm872_vm10, %vm2362_vm7  ;;  %vm942_vm13 = vcmp.ge.f32.partialorder %v940_v22, 0.0  ;;  %v3160_v62 = vld [vmem:[#allocation26_spill] sm:$0xff] }
 0x163   :  { %v3138_v27 = vand.u32 2147483647, %v2178_v15  ;;  %v1050_v10 = vsub.f32 %v1040_v17, %v1048_v45  ;;  %v1062_v59 = vmul.f32 %v2071_v8, %v2218_v28  ;;  %v1444_v3 = vsel %vm878_vm11, 1.0, %v3121_v48  ;;  %vm932_vm12 = vmand %vm926_vm6, %vm930_vm8 }
 0x164   :  { %vm998_vm0 = vcmp.ne.f32.partialorder %v978_v7, 0.0  ;;  %vm2385_vm14 = vcmp.le.f32.partialorder %v1018_v5, %v996_v0  ;;  %v884_v15 = vmax.f32 %v812_v34, %v1444_v3  ;;  %vm938_vm4 = vmand %vm932_vm12, %vm2353_vm2  ;;  %vm1002_vm5 = vcmp.ge.f32.partialorder %v1000_v47, 0.0  ;;  %v3159_v7 = vld [vmem:[#allocation44_spill] sm:$0xff] }
 0x165   :  { %vm2378_vm15 = vcmp.le.f32.partialorder %v3138_v27, %v996_v0  ;;  %v1066_v52 = vsub.f32 %v1062_v59, %v2265_v57  ;;  %v1068_v6 = vand.u32 2147483647, %v1050_v10  ;;  %vm944_vm7 = vmand %vm938_vm4, %vm942_vm13  ;;  %vm948_vm9 = vcmp.le.f32.partialorder %v946_v38, %v924_v31  ;;  %v3162_v0 = vld [vmem:[#allocation46_spill] sm:$0xff] }
 0x166   :  { %v1072_v8 = vmul.f32 %v2188_v13, %v1050_v10  ;;  %v1120_v49 = vmul.f32 %v2060_v21, %v2218_v28  ;;  %v1134_v9 = vmul.f32 %v2085_v4, %v2218_v28  ;;  %vm950_vm6 = vmand %vm944_vm7, %vm948_vm9  ;;  %vm1014_vm10 = vcmp.ge.f32.partialorder %v1012_v33, 0.0 }
 0x167   :  { %vm2401_vm8 = vcmp.le.f32.partialorder %v3143_v23, %v1068_v6  ;;  %v1084_v50 = vmul.f32 %v1066_v52, %v1050_v10  ;;  %v1090_v57 = vand.u32 2147483647, %v1066_v52  ;;  %v1446_v26 = vsel %vm950_vm6, 1.0, %v3121_v48  ;;  %vm1004_vm2 = vmand %vm998_vm0, %vm1002_vm5  ;;  %v3166_v52 = vld [vmem:[#allocation22_spill] sm:$0xff] }
 0x168   :  { %v1122_v36 = vsub.f32 %v1112_v42, %v1120_v49  ;;  %v1138_v32 = vsub.f32 %v1134_v9, %v1136_v18  ;;  %v956_v21 = vmax.f32 %v884_v15, %v1446_v26  ;;  %vm1010_vm11 = vmand %vm1004_vm2, %vm2378_vm15  ;;  %vm1070_vm13 = vcmp.ne.f32.partialorder %v1050_v10, 0.0  ;;  %v3165_v42 = vld [vmem:[#allocation17_spill] sm:$0xff]  ;;  %v3169_v9 = vld [vmem:[#allocation30_spill] sm:$0xff] }
 0x169   :  { %vm1074_vm12 = vcmp.ge.f32.partialorder %v1072_v8, 0.0  ;;  %vm2409_vm4 = vcmp.le.f32.partialorder %v1090_v57, %v1068_v6  ;;  %vm1016_vm7 = vmand %vm1010_vm11, %vm1014_vm10  ;;  %v1150_v56 = vand.u32 2147483647, %v2196_v55  ;;  %vm1086_vm5 = vcmp.ge.f32.partialorder %v1084_v50, 0.0  ;;  %v3168_v8 = vld [vmem:[#allocation28_spill] sm:$0xff] }
 0x16a   :  { %v1140_v28 = vand.u32 2147483647, %v1122_v36  ;;  %v1144_v13 = vmul.f32 %v2196_v55, %v1122_v36  ;;  %v1156_v63 = vmul.f32 %v1138_v32, %v1122_v36  ;;  %vm1022_vm0 = vmand %vm1016_vm7, %vm2385_vm14  ;;  %v1162_v60 = vand.u32 2147483647, %v1138_v32  ;;  %v3171_v57 = vld [vmem:[#allocation32_spill] sm:$0xff] }
 0x16b   :  { %v1448_v19 = vsel %vm1022_vm0, 1.0, %v3121_v48  ;;  %vm1076_vm15 = vmand %vm1070_vm13, %vm1074_vm12  ;;  %vm1142_vm2 = vcmp.ne.f32.partialorder %v1122_v36, 0.0  ;;  %v3151_v35 = vperm.slane %v3150_v37, 1  ;;  %v1244_v39 = vperm.slane %v3152_v44, 2  ;;  %v3172_v36 = vld [vmem:[#allocation36_spill] sm:$0xff] }
 0x16c   :  { %vm1152_vm9 = vcmp.le.f32.partialorder %v1150_v56, %v1140_v28  ;;  %v1028_v58 = vmax.f32 %v956_v21, %v1448_v19  ;;  %vm1082_vm6 = vmand %vm1076_vm15, %vm2401_vm8  ;;  %vm1146_vm10 = vcmp.ge.f32.partialorder %v1144_v13, 0.0  ;;  %vm1164_vm11 = vcmp.le.f32.partialorder %v1162_v60, %v1140_v28  ;;  %v3173_v21 = vld [vmem:[#allocation38_spill] sm:$0xff]  ;;  %v3174_v13 = vld [vmem:[#allocation40_spill] sm:$0xff] }
 0x16d   :  { %vm1088_vm1 = vmand %vm1082_vm6, %vm1086_vm5  ;;  %vm1158_vm13 = vcmp.ge.f32.partialorder %v1156_v63, 0.0  ;;  %v1251_v30 = vperm.slane %v3152_v44, 3  ;;  %v1201_v25 = vand.u32 65535, %v3153_v20  ;;  %v3155_v53 = vmov 0   ;;  %v3175_v63 = vld [vmem:[#allocation42_spill] sm:$0xff]  ;;  %v3176_v37 = vld [vmem:[#allocation16_spill] sm:$0xff] }
 0x16e   :  { %vm1094_vm3 = vmand %vm1088_vm1, %vm2409_vm4  ;;  %v3158_v18 = vrot.slane %v3157_v54, 1  ;;  %v3161_v46 = vrot.slane %v3160_v62, 1  ;;  %v3163_v38 = vperm.slane %v3156_v14, 0  ;;  %v3164_v33 = vperm.slane %v3159_v7, 0 }
 0x16f   :  { %v1450_v55 = vsel %vm1094_vm3, 1.0, %v3121_v48  ;;  %vm1148_vm14 = vmand %vm1142_vm2, %vm1146_vm10  ;;  %v1476_v61 = vpack.i.bf16 %v1251_v30, %v1244_v39  ;;  %v1203_v43 = vcvt.s32.f32 %v1201_v25  ;;  %v1230_v10 = vperm.slane %v3152_v44, 0  ;;  %v3178_v39 = vld [vmem:[#allocation27_spill] sm:$0xff] }
 0x170   :  { %v2423_v51 = vmax.f32 %v1028_v58, %v1450_v55  ;;  %vm1154_vm7 = vmand %vm1148_vm14, %vm1152_vm9  ;;  %v2443_v22 = vsub.f32 %v3158_v18, %v3156_v14  ;;  %v2448_v29 = vsub.f32 %v3161_v46, %v3159_v7  ;;  %v2457_v47 = vsub.f32 %v3163_v38, %v3162_v0  ;;  %v3182_v46 = vld [vmem:[#allocation35_spill] sm:$0xff] }
 0x171   :  { %vm1160_vm12 = vmand %vm1154_vm7, %vm1158_vm13  ;;  %v1237_v59 = vperm.slane %v3152_v44, 1  ;;  %v1186_v15 = vand.u32 65535, %v3165_v42  ;;  %v3167_v6 = vrot.slane %v3166_v52, 1  ;;  %v601_v23 = vsub.f32 %v3169_v9, %v3168_v8 }
 0x172   :  { %3148 = vst [vmem:[#allocation20_spill] sm:$0xff] %v2423_v51  ;;  %vm1166_vm0 = vmand %vm1160_vm12, %vm1164_vm11  ;;  %v3004_v45 = vperm.slane %v2448_v29, 0  ;;  %v3003_v34 = vperm.slane %v2443_v22, 0  ;;  %v673_v26 = vsub.f32 %v3171_v57, %v3169_v9  ;;  %v745_v32 = vsub.f32 %v3172_v36, %v3171_v57 }
 0x173   :  { %v2426_v24 = vsel %vm1166_vm0, 1.0, %v3121_v48  ;;  %v1471_v12 = vpack.i.bf16 %v1237_v59, %v1230_v10  ;;  %v2479_v49 = vsub.f32 %v3168_v8, %v3167_v6  ;;  %v1188_v50 = vcvt.s32.f32 %v1186_v15  ;;  %v3187_v6 = vld [vmem:[#allocation39_spill] sm:$0xff] }
 0x174   :  { %3149 = vst [vmem:[#allocation18_spill] sm:$0xff] %v2426_v24  ;;  %v1129_v27 = vmul.f32 %v2457_v47, %v3004_v45  ;;  %v817_v4 = vsub.f32 %v3173_v21, %v3172_v36  ;;  %v889_v56 = vsub.f32 %v3174_v13, %v3173_v21  ;;  %v961_v60 = vsub.f32 %v3175_v63, %v3174_v13 }
 0x175   :  { %v1033_v19 = vsub.f32 %v3159_v7, %v3175_v63  ;;  %v3006_v58 = vperm.slane %v2479_v49, 0  ;;  %v2502_v55 = vperm.slane %v673_v26, 0  ;;  %v2509_v20 = vperm.slane %v745_v32, 0  ;;  %v3181_v7 = vld [vmem:[#allocation33_spill] sm:$0xff]  ;;  %v3188_v26 = vld [vmem:[#allocation34_spill] sm:$0xff] }
 0x176   :  { %v2511_v25 = vperm.slane %v817_v4, 0  ;;  %v2517_v54 = vperm.slane %v889_v56, 0  ;;  %v2519_v18 = vperm.slane %v961_v60, 0  ;;  %v2523_v62 = vsub.f32 %v3181_v7, %v3162_v0  ;;  %v3190_v56 = vld [vmem:[#allocation41_spill] sm:$0xff] }
 0x177   :  { %v3184_v10 = vperm.slane %v3178_v39, 0  ;;  %v3189_v4 = vperm.slane %v3182_v46, 0  ;;  %v959_v60 = vsub.f32 %v3190_v56, %v3187_v6  ;;  %v3193_v7 = vperm.slane %v3169_v9, 0 }
 0x178   :  { %v3196_v9 = vperm.slane %v3173_v21, 0  ;;  %v3200_v11 = vperm.slane %v3175_v63, 0 }
 0x179   :  { %v2534_v59 = vsub.f32 %v3184_v10, %v3162_v0 }
 0x17a   :  { %244 = vperm.xlu1 %1470, %v3151_v35   ;;  %v3177_v35 = vrot.slane %v3176_v37, 1 }
 0x17c   :  { %v2507_v30 = vsub.f32 %v3178_v39, %v3177_v35  ;;  %v3191_v35 = vperm.slane %v3168_v8, 0  ;;  %v3194_v8 = vperm.slane %v3171_v57, 0 }
 0x182   :  { %1477 = vperm.xlu1 %1470, %v1476_v61   ;;  %v3179_v61 = vld [vmem:[#allocation29_spill] sm:$0xff] }
 0x18a   :  { %1488 = vset.pattern.permute.xlu1 %v3155_v53 }
 0x1a7   :  { %v2435_v31 = vpop.xlane.xlu2 %1205 }
 0x1a8   :  { %vm1207_vm1 = vcmp.eq.f32.partialorder %v3154_v40, %v2435_v31  ;;  %v3180_v40 = vld [vmem:[#allocation31_spill] sm:$0xff] }
 0x1a9   :  { %v1208_v1 = vsel %vm1207_vm1, %v1203_v43, inf  ;;  %v2450_v17 = vpop.permute.xlu1 %547  ;;  %v599_v43 = vsub.f32 %v3179_v61, %v3178_v39  ;;  %v743_v38 = vsub.f32 %v3182_v46, %v3180_v40  ;;  %v3186_v15 = vperm.slane %v3180_v40, 0 }
 0x1aa   :  { %1209 = vmin.xlane.f32.xlu2 %v1208_v1  ;;  %v2462_v5 = vsub.f32 %v3164_v33, %v2450_v17  ;;  %v671_v1 = vsub.f32 %v3180_v40, %v3179_v61  ;;  %v3183_v33 = vld [vmem:[#allocation37_spill] sm:$0xff]  ;;  %v551_v32 = vsub.f32 %v3188_v26, %v2450_v17  ;;  %v623_v39 = vsub.f32 %v3191_v35, %v2450_v17 }
 0x1ab   :  { %v2544_v52 = vsub.f32 %v3186_v15, %v3162_v0  ;;  %v2573_v10 = vperm.slane %v743_v38, 0  ;;  %v911_v38 = vsub.f32 %v3196_v9, %v2450_v17 }
 0x1ac   :  { %v1131_v41 = vmul.f32 %v2462_v5, %v3003_v34  ;;  %v2560_v37 = vperm.slane %v671_v1, 0  ;;  %v767_v1 = vsub.f32 %v3194_v8, %v2450_v17  ;;  %v1258_v8 = vperm.slane %v3152_v44, 4 }
 0x1ad   :  { %v769_v45 = vmul.f32 %v2544_v52, %v2509_v20 }
 0x1ae   :  { %v2472_v3 = vsub.f32 %v1129_v27, %v1131_v41  ;;  %v815_v27 = vsub.f32 %v3183_v33, %v3182_v46  ;;  %v2529_v41 = vperm.slane %v1033_v19, 0  ;;  %v2558_v19 = vperm.slane %v599_v43, 0 }
 0x1af   :  { %v695_v46 = vsub.f32 %v3193_v7, %v2450_v17  ;;  %v1031_v43 = vsub.f32 %v3156_v14, %v3190_v56  ;;  %v3197_v14 = vperm.slane %v3187_v6, 0  ;;  %v771_v9 = vmul.f32 %v767_v1, %v2573_v10 }
 0x1b1   :  { %v2597_v57 = vsub.f32 %v3197_v14, %v3162_v0 }
 0x1c2   :  { %1472 = vperm.xlu2 %1466, %v1471_v12   ;;  %v3185_v12 = vperm.slane %v3179_v61, 0  ;;  %v3192_v61 = vperm.slane %v3183_v33, 0 }
 0x1c4   :  { %v2539_v42 = vsub.f32 %v3185_v12, %v3162_v0  ;;  %v2568_v40 = vsub.f32 %v3192_v61, %v3162_v0  ;;  %v2575_v12 = vperm.slane %v815_v27, 0  ;;  %v627_v61 = vmul.f32 %v623_v39, %v2558_v19 }
 0x1ca   :  { %1486 = vset.pattern.permute.xlu2 %v3155_v53 }
 0x1d4   :  { %v2483_v16 = vpop.xlane.xlu1 %1190 }
 0x1d5   :  { %3170 = vst [vmem:[#allocation25_spill] sm:$0xff] %v2483_v16  ;;  %vm1192_vm3 = vcmp.eq.f32.partialorder %v2220_v2, %v2483_v16  ;;  %v2500_v2 = vperm.slane %v601_v23, 0  ;;  %v887_v23 = vsub.f32 %v3187_v6, %v3183_v33  ;;  %v3195_v33 = vperm.slane %v3172_v36, 0 }
 0x1d6   :  { %v1193_v28 = vsel %vm1192_vm3, %v1188_v50, inf  ;;  %v3005_v50 = vperm.slane %v2507_v30, 0  ;;  %v3198_v36 = vperm.slane %v3174_v13, 0  ;;  %v699_v6 = vmul.f32 %v695_v46, %v2560_v37 }
 0x1d7   :  { %1194 = vmin.xlane.f32.xlu0 %v1193_v28  ;;  %v2554_v28 = vsub.f32 %v3189_v4, %v3162_v0  ;;  %v839_v15 = vsub.f32 %v3195_v33, %v2450_v17  ;;  %v2585_v26 = vperm.slane %v887_v23, 0  ;;  %v2592_v4 = vperm.slane %v959_v60, 0 }
 0x1d8   :  { %v555_v27 = vmul.f32 %v551_v32, %v3005_v50  ;;  %v983_v35 = vsub.f32 %v3198_v36, %v2450_v17  ;;  %v553_v23 = vmul.f32 %v2523_v62, %v3006_v58  ;;  %v625_v21 = vmul.f32 %v2534_v59, %v2500_v2 }
 0x1d9   :  { %v3199_v60 = vperm.slane %v3190_v56, 0  ;;  %v1265_v13 = vperm.slane %v3152_v44, 5  ;;  %v2616_v33 = vperm.slane %v1031_v43, 0  ;;  %v843_v14 = vmul.f32 %v839_v15, %v2575_v12  ;;  %v2629_v44 = vpop.permute.xlu2 %230 }
 0x1da   :  { %v915_v36 = vmul.f32 %v911_v38, %v2585_v26  ;;  %v2624_v56 = vsub.f32 %v3200_v11, %v2450_v17  ;;  %v987_v34 = vmul.f32 %v983_v35, %v2592_v4  ;;  %v2631_v43 = vsub.f32 %v625_v21, %v627_v61 }
 0x1db   :  { %v2611_v7 = vsub.f32 %v3199_v60, %v3162_v0  ;;  %v697_v0 = vmul.f32 %v2539_v42, %v2502_v55  ;;  %v557_v60 = vsub.f32 %v553_v23, %v555_v27  ;;  %v841_v50 = vmul.f32 %v2554_v28, %v2511_v25 }
 0x1dc   :  { %v913_v11 = vmul.f32 %v2568_v40, %v2517_v54  ;;  %v1481_v17 = vpack.i.bf16 %v1265_v13, %v1258_v8  ;;  %v985_v27 = vmul.f32 %v2597_v57, %v2519_v18  ;;  %v2647_v21 = vsub.f32 %v769_v45, %v771_v9 }
 0x1dd   :  { %v2639_v63 = vsub.f32 %v697_v0, %v699_v6  ;;  %v2645_v23 = vmul.f32 %v2611_v7, %v2529_v41  ;;  %v2649_v61 = vsub.f32 %v841_v50, %v843_v14  ;;  %v1059_v24 = vmul.f32 %v2624_v56, %v2616_v33 }
 0x1de   :  { %v2651_v58 = vsub.f32 %v913_v11, %v915_v36  ;;  %v3201_v6 = vperm.slane %v2479_v49, 0  ;;  %v561_v13 = vmul.f32 %v551_v32, %v2629_v44  ;;  %v575_v0 = vand.u32 2147483647, %v557_v60 }
 0x1df   :  { %v2659_v51 = vsub.f32 %v985_v27, %v987_v34  ;;  %v609_v45 = vmul.f32 %v2500_v2, %v2629_v44  ;;  %v633_v50 = vmul.f32 %v623_v39, %v2629_v44  ;;  %v647_v9 = vand.u32 2147483647, %v2631_v43 }
 0x1e0   :  { %v517_v8 = vmul.f32 %v3201_v6, %v2629_v44  ;;  %v681_v14 = vmul.f32 %v2502_v55, %v2629_v44  ;;  %v705_v36 = vmul.f32 %v695_v46, %v2629_v44  ;;  %v753_v32 = vmul.f32 %v2509_v20, %v2629_v44 }
 0x1e1   :  { %v777_v34 = vmul.f32 %v767_v1, %v2629_v44  ;;  %v2677_v39 = vmul.f32 %v2511_v25, %v2629_v44  ;;  %v2680_v55 = vmul.f32 %v839_v15, %v2629_v44  ;;  %v2696_v15 = vmul.f32 %v2517_v54, %v2629_v44 }
 0x1e2   :  { %v2699_v46 = vmul.f32 %v911_v38, %v2629_v44  ;;  %v2711_v54 = vmul.f32 %v983_v35, %v2629_v44 }
 0x1eb   :  { %1482 = vperm.xlu0 %1469, %v1481_v17   ;;  %v3202_v17 = vperm.slane %v2507_v30, 0 }
 0x1ec   :  { %v2672_v11 = vpop.permute.xlu1 %244 }
 0x1ed   :  { %v525_v27 = vmul.f32 %v3202_v17, %v2672_v11  ;;  %v559_v20 = vmul.f32 %v2523_v62, %v2672_v11  ;;  %v617_v1 = vmul.f32 %v2558_v19, %v2672_v11  ;;  %v631_v6 = vmul.f32 %v2534_v59, %v2672_v11 }
 0x1ee   :  { %v689_v25 = vmul.f32 %v2560_v37, %v2672_v11  ;;  %v703_v19 = vmul.f32 %v2539_v42, %v2672_v11  ;;  %v761_v59 = vmul.f32 %v2573_v10, %v2672_v11  ;;  %v2708_v37 = vmul.f32 %v2519_v18, %v2629_v44 }
 0x1ef   :  { %v527_v17 = vsub.f32 %v517_v8, %v525_v27  ;;  %v563_v62 = vsub.f32 %v559_v20, %v561_v13  ;;  %v619_v2 = vsub.f32 %v609_v45, %v617_v1  ;;  %v635_v49 = vsub.f32 %v631_v6, %v633_v50 }
 0x1f0   :  { %v691_v8 = vsub.f32 %v681_v14, %v689_v25  ;;  %v775_v42 = vmul.f32 %v2544_v52, %v2672_v11  ;;  %v707_v10 = vsub.f32 %v703_v19, %v705_v36  ;;  %v2720_v50 = vmul.f32 %v2529_v41, %v2629_v44 }
 0x1f1   :  { %v565_v38 = vand.u32 2147483647, %v527_v17  ;;  %v569_v16 = vmul.f32 %v557_v60, %v527_v17  ;;  %v581_v30 = vmul.f32 %v563_v62, %v527_v17  ;;  %v587_v13 = vand.u32 2147483647, %v563_v62 }
 0x1f2   :  { %v637_v45 = vand.u32 2147483647, %v619_v2  ;;  %v641_v27 = vmul.f32 %v2631_v43, %v619_v2  ;;  %vm567_vm8 = vcmp.ne.f32.partialorder %v527_v17, 0.0  ;;  %v653_v18 = vmul.f32 %v635_v49, %v619_v2 }
 0x1f3   :  { %vm571_vm4 = vcmp.ge.f32.partialorder %v569_v16, 0.0  ;;  %vm577_vm15 = vcmp.le.f32.partialorder %v575_v0, %v565_v38  ;;  %1487 = vset.pattern.permute.xlu0 %v3155_v53  ;;  %v659_v35 = vand.u32 2147483647, %v635_v49  ;;  %v1007_v60 = vand.u32 2147483647, %v2659_v51 }
 0x1f4   :  { %vm573_vm5 = vmand %vm567_vm8, %vm571_vm4  ;;  %vm583_vm6 = vcmp.ge.f32.partialorder %v581_v30, 0.0  ;;  %vm643_vm2 = vcmp.ge.f32.partialorder %v641_v27, 0.0  ;;  %v713_v52 = vmul.f32 %v2639_v63, %v691_v8  ;;  %v2723_v43 = vsub.f32 %v753_v32, %v761_v59 }
 0x1f5   :  { %vm579_vm9 = vmand %vm573_vm5, %vm577_vm15  ;;  %vm589_vm11 = vcmp.le.f32.partialorder %v587_v13, %v565_v38  ;;  %vm2725_vm14 = vcmp.le.f32.partialorder %v647_v9, %v637_v45  ;;  %v709_v16 = vand.u32 2147483647, %v691_v8  ;;  %v2730_v0 = vsub.f32 %v2645_v23, %v1059_v24 }
 0x1f6   :  { %vm585_vm10 = vmand %vm579_vm9, %vm583_vm6  ;;  %vm639_vm13 = vcmp.ne.f32.partialorder %v619_v2, 0.0  ;;  %v725_v41 = vmul.f32 %v707_v10, %v691_v8  ;;  %v731_v14 = vand.u32 2147483647, %v707_v10  ;;  %v779_v36 = vsub.f32 %v775_v42, %v777_v34 }
 0x1f7   :  { %vm591_vm7 = vmand %vm585_vm10, %vm589_vm11  ;;  %vm655_vm0 = vcmp.ge.f32.partialorder %v653_v18, 0.0  ;;  %vm2733_vm1 = vcmp.le.f32.partialorder %v659_v35, %v637_v45  ;;  %vm711_vm3 = vcmp.ne.f32.partialorder %v691_v8, 0.0  ;;  %vm715_vm4 = vcmp.ge.f32.partialorder %v713_v52, 0.0 }
 0x1f8   :  { %v1437_v49 = vsel %vm591_vm7, 1.0, %v3121_v48  ;;  %vm645_vm12 = vmand %vm639_vm13, %vm643_vm2  ;;  %v781_v24 = vand.u32 2147483647, %v2723_v43  ;;  %v785_v23 = vmul.f32 %v2647_v21, %v2723_v43  ;;  %v3207_v34 = vand.u32 2147483647, %v2639_v63 }
 0x1f9   :  { %v597_v9 = vmax.f32 %v1437_v49, 0.0  ;;  %vm651_vm8 = vmand %vm645_vm12, %vm2725_vm14  ;;  %v833_v20 = vmul.f32 %v2575_v12, %v2672_v11  ;;  %v847_v1 = vmul.f32 %v2554_v28, %v2672_v11  ;;  %v905_v6 = vmul.f32 %v2585_v26, %v2672_v11 }
 0x1fa   :  { %vm657_vm15 = vmand %vm651_vm8, %vm655_vm0  ;;  %vm2744_vm5 = vcmp.le.f32.partialorder %v3207_v34, %v709_v16  ;;  %vm727_vm6 = vcmp.ge.f32.partialorder %v725_v41, 0.0  ;;  %vm2756_vm2 = vcmp.le.f32.partialorder %v731_v14, %v709_v16  ;;  %v919_v63 = vmul.f32 %v2568_v40, %v2672_v11 }
 0x1fb   :  { %vm663_vm9 = vmand %vm657_vm15, %vm2733_vm1  ;;  %v977_v12 = vmul.f32 %v2592_v4, %v2672_v11  ;;  %v835_v28 = vsub.f32 %v2677_v39, %v833_v20  ;;  %v851_v26 = vsub.f32 %v847_v1, %v2680_v55  ;;  %v2769_v17 = vsub.f32 %v2696_v15, %v905_v6 }
 0x1fc   :  { %v1439_v30 = vsel %vm663_vm9, 1.0, %v3121_v48  ;;  %vm717_vm10 = vmand %vm711_vm3, %vm715_vm4  ;;  %vm787_vm14 = vcmp.ge.f32.partialorder %v785_v23, 0.0  ;;  %v3212_v40 = vand.u32 2147483647, %v2647_v21  ;;  %v797_v19 = vmul.f32 %v779_v36, %v2723_v43 }
 0x1fd   :  { %v669_v62 = vmax.f32 %v597_v9, %v1439_v30  ;;  %vm723_vm11 = vmand %vm717_vm10, %vm2744_vm5  ;;  %v803_v39 = vand.u32 2147483647, %v779_v36  ;;  %v853_v59 = vand.u32 2147483647, %v835_v28  ;;  %v857_v55 = vmul.f32 %v2649_v61, %v835_v28 }
 0x1fe   :  { %vm2775_vm7 = vcmp.le.f32.partialorder %v3212_v40, %v781_v24  ;;  %vm729_vm13 = vmand %vm723_vm11, %vm727_vm6  ;;  %v991_v15 = vmul.f32 %v2597_v57, %v2672_v11  ;;  %vm783_vm0 = vcmp.ne.f32.partialorder %v2723_v43, 0.0  ;;  %v869_v21 = vmul.f32 %v851_v26, %v835_v28 }
 0x1ff   :  { %vm735_vm12 = vmand %vm729_vm13, %vm2756_vm2  ;;  %v875_v38 = vand.u32 2147483647, %v851_v26  ;;  %v1065_v8 = vmul.f32 %v2624_v56, %v2629_v44  ;;  %v923_v45 = vsub.f32 %v919_v63, %v2699_v46  ;;  %v929_v27 = vmul.f32 %v2651_v58, %v2769_v17 }
 0x200   :  { %v1441_v13 = vsel %vm735_vm12, 1.0, %v3121_v48  ;;  %vm789_vm1 = vmand %vm783_vm0, %vm787_vm14  ;;  %v2793_v57 = vsub.f32 %v2708_v37, %v977_v12  ;;  %vm799_vm8 = vcmp.ge.f32.partialorder %v797_v19, 0.0  ;;  %vm859_vm4 = vcmp.ge.f32.partialorder %v857_v55, 0.0 }
 0x201   :  { %v741_v42 = vmax.f32 %v669_v62, %v1441_v13  ;;  %vm795_vm3 = vmand %vm789_vm1, %vm2775_vm7  ;;  %v925_v10 = vand.u32 2147483647, %v2769_v17  ;;  %vm805_vm5 = vcmp.le.f32.partialorder %v803_v39, %v781_v24  ;;  %v3215_v56 = vand.u32 2147483647, %v2649_v61 }
 0x202   :  { %vm801_vm15 = vmand %vm795_vm3, %vm799_vm8  ;;  %v995_v18 = vsub.f32 %v991_v15, %v2711_v54  ;;  %v3218_v37 = vperm.slane %v2448_v29, 0  ;;  %vm855_vm2 = vcmp.ne.f32.partialorder %v835_v28, 0.0  ;;  %vm871_vm10 = vcmp.ge.f32.partialorder %v869_v21, 0.0 }
 0x203   :  { %vm2800_vm9 = vcmp.le.f32.partialorder %v3215_v56, %v853_v59  ;;  %vm807_vm6 = vmand %vm801_vm15, %vm805_vm5  ;;  %vm2808_vm11 = vcmp.le.f32.partialorder %v875_v38, %v853_v59  ;;  %v1049_v61 = vmul.f32 %v2616_v33, %v2672_v11  ;;  %vm931_vm7 = vcmp.ge.f32.partialorder %v929_v27, 0.0  ;;  %v3233_v38 = vld [vmem:[#allocation12_spill] sm:$0xff]  ;;  %v3235_v27 = vld [vmem:[#allocation25_spill] sm:$0xff] }
 0x204   :  { %v1113_v35 = vmul.f32 %v3218_v37, %v2629_v44  ;;  %v1443_v43 = vsel %vm807_vm6, 1.0, %v3121_v48  ;;  %vm861_vm14 = vmand %vm855_vm2, %vm859_vm4  ;;  %v941_v54 = vmul.f32 %v923_v45, %v2769_v17  ;;  %v1001_v29 = vmul.f32 %v2659_v51, %v2793_v57  ;;  %v3237_v37 = vld [vmem:[#allocation18_spill] sm:$0xff] }
 0x205   :  { %v813_v53 = vmax.f32 %v741_v42, %v1443_v43  ;;  %vm867_vm13 = vmand %vm861_vm14, %vm2800_vm9  ;;  %v3221_v16 = vand.u32 2147483647, %v2651_v58  ;;  %v947_v33 = vand.u32 2147483647, %v923_v45  ;;  %v997_v14 = vand.u32 2147483647, %v2793_v57  ;;  %v1478_v43 = vpop.permute.xlu1 %1477 }
 0x206   :  { %vm873_vm0 = vmand %vm867_vm13, %vm871_vm10  ;;  %v1051_v36 = vsub.f32 %v2720_v50, %v1049_v61  ;;  %v1063_v49 = vmul.f32 %v2611_v7, %v2672_v11  ;;  %v3224_v32 = vperm.slane %v2443_v22, 0  ;;  %v1135_v58 = vmul.f32 %v2457_v47, %v2672_v11 }
 0x207   :  { %vm2822_vm12 = vcmp.le.f32.partialorder %v3221_v16, %v925_v10  ;;  %vm879_vm1 = vmand %vm873_vm0, %vm2808_vm11  ;;  %vm927_vm3 = vcmp.ne.f32.partialorder %v2769_v17, 0.0  ;;  %v1013_v24 = vmul.f32 %v995_v18, %v2793_v57  ;;  %v1079_v23 = vand.u32 2147483647, %v2730_v0 }
 0x208   :  { %v1121_v9 = vmul.f32 %v3224_v32, %v2672_v11  ;;  %v1137_v50 = vmul.f32 %v2462_v5, %v2629_v44  ;;  %v1445_v7 = vsel %vm879_vm1, 1.0, %v3121_v48  ;;  %vm933_vm8 = vmand %vm927_vm3, %vm931_vm7  ;;  %vm943_vm4 = vcmp.ge.f32.partialorder %v941_v54, 0.0 }
 0x209   :  { %vm1003_vm15 = vcmp.ge.f32.partialorder %v1001_v29, 0.0  ;;  %v1067_v22 = vsub.f32 %v1063_v49, %v1065_v8  ;;  %v885_v47 = vmax.f32 %v813_v53, %v1445_v7  ;;  %vm939_vm5 = vmand %vm933_vm8, %vm2822_vm12  ;;  %v1073_v11 = vmul.f32 %v2730_v0, %v1051_v36 }
 0x20a   :  { %v1123_v34 = vsub.f32 %v1113_v35, %v1121_v9  ;;  %v1139_v2 = vsub.f32 %v1135_v58, %v1137_v50  ;;  %vm945_vm9 = vmand %vm939_vm5, %vm943_vm4  ;;  %vm949_vm6 = vcmp.le.f32.partialorder %v947_v33, %v925_v10  ;;  %vm2849_vm2 = vcmp.le.f32.partialorder %v1007_v60, %v997_v14 }
 0x20b   :  { %v1019_v44 = vand.u32 2147483647, %v995_v18  ;;  %v1069_v20 = vand.u32 2147483647, %v1051_v36  ;;  %vm951_vm10 = vmand %vm945_vm9, %vm949_vm6  ;;  %vm999_vm11 = vcmp.ne.f32.partialorder %v2793_v57, 0.0  ;;  %vm1015_vm7 = vcmp.ge.f32.partialorder %v1013_v24, 0.0 }
 0x20c   :  { %v1141_v1 = vand.u32 2147483647, %v1123_v34  ;;  %v1145_v6 = vmul.f32 %v2472_v3, %v1123_v34  ;;  %v1151_v0 = vand.u32 2147483647, %v2472_v3  ;;  %v1447_v25 = vsel %vm951_vm10, 1.0, %v3121_v48  ;;  %vm1005_vm14 = vmand %vm999_vm11, %vm1003_vm15  ;;  %v3236_v18 = vld [vmem:[#allocation20_spill] sm:$0xff] }
 0x20d   :  { %v1085_v51 = vmul.f32 %v1067_v22, %v1051_v36  ;;  %v1157_v60 = vmul.f32 %v1139_v2, %v1123_v34  ;;  %v957_v63 = vmax.f32 %v885_v47, %v1447_v25  ;;  %vm1011_vm13 = vmand %vm1005_vm14, %vm2849_vm2  ;;  %vm1075_vm12 = vcmp.ge.f32.partialorder %v1073_v11, 0.0 }
 0x20e   :  { %vm2860_vm0 = vcmp.le.f32.partialorder %v1151_v0, %v1141_v1  ;;  %v3227_v12 = vmov 0  ;;  %v1163_v30 = vand.u32 2147483647, %v1139_v2  ;;  %vm1017_vm1 = vmand %vm1011_vm13, %vm1015_vm7  ;;  %vm1021_vm3 = vcmp.le.f32.partialorder %v1019_v44, %v997_v14 }
 0x20f   :  { %v3228_v12 = vsel %vm2860_vm0, 4294967295, %v3227_v12  ;;  %vm1081_vm8 = vcmp.le.f32.partialorder %v1079_v23, %v1069_v20  ;;  %v1091_v3 = vand.u32 2147483647, %v1067_v22  ;;  %vm1023_vm4 = vmand %vm1017_vm1, %vm1021_vm3  ;;  %vm1071_vm5 = vcmp.ne.f32.partialorder %v1051_v36, 0.0 }
 0x210   :  { %vm2864_vm15 = vcmp.le.f32.partialorder %v1163_v30, %v1141_v1  ;;  %v3229_v28 = vmov 0  ;;  %v1449_v26 = vsel %vm1023_vm4, 1.0, %v3121_v48  ;;  %vm1077_vm9 = vmand %vm1071_vm5, %vm1075_vm12  ;;  %vm1087_vm2 = vcmp.ge.f32.partialorder %v1085_v51, 0.0 }
 0x211   :  { %v3230_v28 = vsel %vm2864_vm15, 4294967295, %v3229_v28  ;;  %v1029_v17 = vmax.f32 %v957_v63, %v1449_v26  ;;  %vm1083_vm6 = vmand %vm1077_vm9, %vm1081_vm8  ;;  %vm1147_vm10 = vcmp.ge.f32.partialorder %v1145_v6, 0.0  ;;  %vm1093_vm14 = vcmp.le.f32.partialorder %v1091_v3, %v1069_v20 }
 0x212   :  { %vm1089_vm11 = vmand %vm1083_vm6, %vm1087_vm2  ;;  %vm1143_vm7 = vcmp.ne.f32.partialorder %v1123_v34, 0.0  ;;  %vm3231_vm1 = vnez %v3228_v12  ;;  %vm1159_vm15 = vcmp.ge.f32.partialorder %v1157_v60, 0.0  ;;  %vm3232_vm5 = vnez %v3230_v28 }
 0x213   :  { %vm1095_vm0 = vmand %vm1089_vm11, %vm1093_vm14  ;;  %v1212_v39 = vcvt.f32.s32 %v2435_v31  ;;  %vm3234_vm8 = vcmask 1045504   ;;  %v1197_v57 = vcvt.f32.s32 %v3235_v27  ;;  %v3238_v35 = vmax.f32 %v3236_v18, %v3237_v37  ;;  %v3242_v37 = vld [vmem:[#allocation47_spill] sm:$0xff] }
 0x214   :  { %v1451_v62 = vsel %vm1095_vm0, 1.0, %v3121_v48  ;;  %vm1149_vm13 = vmand %vm1143_vm7, %vm1147_vm10  ;;  %v1479_v41 = vunpack.i.l.bf16 %v1478_v43  ;;  %v1480_v32 = vunpack.i.h.bf16 %v1478_v43  ;;  %vm1350_vm6 = vcmask 1041409  }
 0x215   :  { %v1101_v40 = vmax.f32 %v1029_v17, %v1451_v62  ;;  %vm1155_vm3 = vmand %vm1149_vm13, %vm3231_vm1  ;;  %v1213_v55 = vshll.u32 %v1212_v39, 16  ;;  %v1198_v10 = vshll.u32 %v1197_v57, 16  ;;  %vm1352_vm2 = vcmask 1042434  }
 0x216   :  { %vm1161_vm4 = vmand %vm1155_vm3, %vm1159_vm15  ;;  %vm1354_vm10 = vcmask 1043459   ;;  %vm1356_vm11 = vcmask 1044484   ;;  %vm1358_vm14 = vcmask 1045509   ;;  %vm3240_vm7 = vcmask 46080  }
 0x217   :  { %vm1167_vm12 = vmand %vm1161_vm4, %vm3232_vm5 }
 0x218   :  { %v1453_v4 = vsel %vm1167_vm12, 1.0, %v3121_v48  ;;  %vm3239_vm9 = vmmov %vm3234_vm8 }
 0x219   :  { %v1173_v19 = vmax.f32 %v1101_v40, %v1453_v4  ;;  %vm3241_vm13 = vmmov %vm3240_vm7 }
 0x21d   :  { %v1210_v59 = vpop.xlane.xlu2 %1209 }
 0x21e   :  { %v1211_v15 = vcvt.f32.s32 %v1210_v59 }
 0x220   :  { %v1214_v21 = vadd.s32 %v1213_v55, %v1211_v15 }
 0x222   :  { %vm1216_vm0 = vcmp.eq.s32.totalorder %v3233_v38, %v1214_v21 }
 0x223   :  { %v1455_v8 = vsel %vm1216_vm0, 1.0, %v3121_v48 }
 0x224   :  { %v1222_v13 = vmul.f32 %v1455_v8, %v1173_v19 }
 0x225   :  { %v1473_v54 = vpop.permute.xlu2 %1472 }
 0x226   :  { %v1226_v45 = vsel %vm3234_vm8, %v1222_v13, -inf  ;;  %v1475_v53 = vunpack.i.h.bf16 %v1473_v54  ;;  %v1474_v16 = vunpack.i.l.bf16 %v1473_v54 }
 0x227   :  { %1227 = vmax.xlane.f32.xlu0 %v1226_v45 }
 0x24a   :  { %v1195_v42 = vpop.xlane.xlu0 %1194 }
 0x24b   :  { %v1196_v56 = vcvt.f32.s32 %v1195_v42 }
 0x24d   :  { %v1199_v46 = vadd.s32 %v1198_v10, %v1196_v56 }
 0x24f   :  { %vm1215_vm15 = vcmp.eq.s32.totalorder %v3233_v38, %v1199_v46 }
 0x250   :  { %v1454_v31 = vsel %vm1215_vm15, 1.0, %v3121_v48 }
 0x251   :  { %v1221_v52 = vmul.f32 %v1454_v31, %v3238_v35  ;;  %v1374_v35 = vadd.f32 1e-12, %v3242_v37 }
 0x253   :  { %v1223_v61 = vsel %vm3239_vm9, %v1221_v52, -inf  ;;  %v3243_v52 = vld [vmem:[#allocation45_spill] sm:$0xff]  ;;  %1489 = vrsqrt.f32 %v1374_v35  ;;  %vm1394_vm1 = vcmp.eq.f32.partialorder %v1374_v35, inf  ;;  %vm1396_vm4 = vcmp.eq.f32.partialorder %v1374_v35, 0.0 }
 0x254   :  { %1224 = vmax.xlane.f32.xlu1 %v1223_v61  ;;  %v1373_v61 = vadd.f32 1e-12, %v3243_v52  ;;  %vm1415_vm9 = vcmask 41984  }
 0x256   :  { %1491 = vrsqrt.f32 %v1373_v61  ;;  %vm1382_vm3 = vcmp.eq.f32.partialorder %v1373_v61, inf  ;;  %vm1384_vm5 = vcmp.eq.f32.partialorder %v1373_v61, 0.0 }
 0x259   :  { %v1490_v43 = vpop.eup %1489 }
 0x25c   :  { %v1492_v54 = vpop.eup %1491 }
 0x25d   :  { %v1483_v29 = vpop.permute.xlu0 %1482 }
 0x25e   :  { %v1484_v9 = vunpack.i.l.bf16 %v1483_v29  ;;  %v1485_v47 = vunpack.i.h.bf16 %v1483_v29  ;;  %v1388_v29 = vmul.f32 %v1490_v43, %v1374_v35 }
 0x29a   :  { %v1228_v48 = vpop.xlane.xlu0 %1227 }
 0x29b   :  { %v1284_v24 = vmul.f32 %v1474_v16, %v1228_v48  ;;  %v1287_v50 = vmul.f32 %v1480_v32, %v1228_v48  ;;  %v1288_v7 = vmul.f32 %v1484_v9, %v1228_v48  ;;  %v1285_v22 = vmul.f32 %v1475_v53, %v1228_v48 }
 0x29c   :  { %v1286_v34 = vmul.f32 %v1479_v41, %v1228_v48  ;;  %v1289_v2 = vmul.f32 %v1485_v47, %v1228_v48 }
 0x2c7   :  { %v1225_v33 = vpop.xlane.xlu1 %1224 }
 0x2c8   :  { %v1280_v14 = vmul.f32 %v1479_v41, %v1225_v33  ;;  %v1279_v36 = vmul.f32 %v1475_v53, %v1225_v33  ;;  %v1278_v49 = vmul.f32 %v1474_v16, %v1225_v33  ;;  %v1281_v58 = vmul.f32 %v1480_v32, %v1225_v33 }
 0x2c9   :  { %v1282_v23 = vmul.f32 %v1484_v9, %v1225_v33  ;;  %v1283_v11 = vmul.f32 %v1485_v47, %v1225_v33  ;;  %v1376_v53 = vmul.f32 %v1492_v54, %v1373_v61  ;;  %v1389_v16 = vmul.f32 %v1490_v43, %v1388_v29 }
 0x2ca   :  { %1309 = vperm.xlu1 %1488, %v1280_v14   ;;  %1306 = vperm.xlu0 %1487, %v1279_v36  }
 0x2cb   :  { %1303 = vperm.xlu2 %1486, %v1278_v49   ;;  %v1377_v41 = vmul.f32 %v1492_v54, %v1376_v53  ;;  %v1390_v33 = vmul.f32 0.5, %v1389_v16 }
 0x2cd   :  { %v1378_v14 = vmul.f32 0.5, %v1377_v41  ;;  %v1391_v36 = vsub.f32 1.5, %v1390_v33 }
 0x2cf   :  { %v1379_v49 = vsub.f32 1.5, %v1378_v14  ;;  %v1392_v48 = vmul.f32 %v1490_v43, %v1391_v36 }
 0x2d1   :  { %v1380_v32 = vmul.f32 %v1492_v54, %v1379_v49  ;;  %v1393_v9 = vmul.f32 %v1392_v48, %v1374_v35 }
 0x2d2   :  { %1312 = vperm.xlu0 %1487, %v1281_v58   ;;  %1321 = vperm.xlu1 %1488, %v1284_v24  }
 0x2d3   :  { %1315 = vperm.xlu2 %1486, %v1282_v23   ;;  %v1381_v58 = vmul.f32 %v1380_v32, %v1373_v61  ;;  %v1395_v24 = vsel %vm1394_vm1, %v1374_v35, %v1393_v9  ;;  %v1397_v23 = vand.u32 2147483648, %v1374_v35 }
 0x2da   :  { %1330 = vperm.xlu1 %1488, %v1287_v50   ;;  %1333 = vperm.xlu0 %1487, %v1288_v7   ;;  %v1383_v50 = vsel %vm1382_vm3, %v1373_v61, %v1381_v58  ;;  %v1398_v7 = vsel %vm1396_vm4, %v1397_v23, %v1395_v24 }
 0x2db   :  { %1324 = vperm.xlu2 %1486, %v1285_v22   ;;  %v1385_v22 = vand.u32 2147483648, %v1373_v61  ;;  %vm1400_vm12 = vcmp.gt.f32.partialorder %v1398_v7, 1.0 }
 0x2e2   :  { %1318 = vperm.xlu1 %1488, %v1283_v11   ;;  %v1386_v11 = vsel %vm1384_vm5, %v1385_v22, %v1383_v50 }
 0x2e3   :  { %1327 = vperm.xlu2 %1486, %v1286_v34   ;;  %v1402_v34 = vsub.f32 1.0, %v1398_v7  ;;  %vm1399_vm8 = vcmp.gt.f32.partialorder %v1386_v11, 1.0 }
 0x2eb   :  { %1336 = vperm.xlu2 %1486, %v1289_v2   ;;  %v1401_v2 = vsub.f32 1.0, %v1386_v11 }
 0x325   :  { %v1304_v5 = vpop.permute.xlu2 %1303 }
 0x326   :  { %v1338_v28 = vperm.slane %v1304_v5, %v3233_v38  ;;  %v1404_v5 = vsel %vm1400_vm12, 0.0, %v1402_v34 }
 0x32d   :  { %v1316_v44 = vpop.permute.xlu2 %1315 }
 0x32e   :  { %v1342_v42 = vperm.slane %v1316_v44, %v3233_v38 }
 0x335   :  { %v1325_v20 = vpop.permute.xlu2 %1324 }
 0x336   :  { %v1345_v63 = vperm.slane %v1325_v20, %v3233_v38 }
 0x33c   :  { %v1310_v1 = vpop.permute.xlu1 %1309  ;;  %v1307_v6 = vpop.permute.xlu0 %1306 }
 0x33d   :  { %v1328_v0 = vpop.permute.xlu2 %1327  ;;  %v1339_v12 = vperm.slane %v1307_v6, %v3233_v38  ;;  %v1340_v19 = vperm.slane %v1310_v1, %v3233_v38  ;;  %v1403_v1 = vsel %vm1399_vm8, 0.0, %v1401_v2 }
 0x33e   :  { %v1346_v26 = vperm.slane %v1328_v0, %v3233_v38 }
 0x33f   :  { %v1351_v59 = vsel %vm1350_vm6, %v1339_v12, %v1338_v28 }
 0x340   :  { %v1353_v45 = vsel %vm1352_vm2, %v1340_v19, %v1351_v59 }
 0x344   :  { %v1322_v25 = vpop.permute.xlu1 %1321  ;;  %v1313_v51 = vpop.permute.xlu0 %1312 }
 0x345   :  { %v1344_v60 = vperm.slane %v1322_v25, %v3233_v38  ;;  %v1337_v3 = vpop.permute.xlu2 %1336  ;;  %v1341_v55 = vperm.slane %v1313_v51, %v3233_v38 }
 0x346   :  { %v1349_v15 = vperm.slane %v1337_v3, %v3233_v38 }
 0x347   :  { %v1360_v30 = vsel %vm1350_vm6, %v1345_v63, %v1344_v60  ;;  %v1355_v57 = vsel %vm1354_vm10, %v1341_v55, %v1353_v45 }
 0x348   :  { %v1361_v39 = vsel %vm1352_vm2, %v1346_v26, %v1360_v30  ;;  %v1357_v46 = vsel %vm1356_vm11, %v1342_v42, %v1355_v57 }
 0x34c   :  { %v1331_v17 = vpop.permute.xlu1 %1330  ;;  %v1334_v62 = vpop.permute.xlu0 %1333 }
 0x34d   :  { %v1347_v40 = vperm.slane %v1331_v17, %v3233_v38  ;;  %v1348_v4 = vperm.slane %v1334_v62, %v3233_v38 }
 0x34f   :  { %v1362_v21 = vsel %vm1354_vm10, %v1347_v40, %v1361_v39 }
 0x350   :  { %v1363_v8 = vsel %vm1356_vm11, %v1348_v4, %v1362_v21 }
 0x351   :  { %v1364_v13 = vsel %vm1358_vm14, %v1349_v15, %v1363_v8 }
 0x352   :  { %v1370_v27 = vsel %vm3240_vm7, %v1364_v13, -inf }
 0x353   :  { %1371 = vmax.xlane.f32.xlu1 %v1370_v27 }
 0x354   :  { %v1319_v10 = vpop.permute.xlu1 %1318 }
 0x355   :  { %v1343_v56 = vperm.slane %v1319_v10, %v3233_v38 }
 0x357   :  { %v1359_v31 = vsel %vm1358_vm14, %v1343_v56, %v1357_v46 }
 0x358   :  { %v1367_v18 = vsel %vm3241_vm13, %v1359_v31, -inf }
 0x359   :  { %1368 = vmax.xlane.f32.xlu0 %v1367_v18 }
 0x3c6   :  { %v1372_v47 = vpop.xlane.xlu1 %1371 }
 0x3c7   :  { %vm1406_vm0 = vcmp.gt.f32.partialorder %v1372_v47, 0.5 }
 0x3c8   :  { %v1408_v44 = vsel %vm1406_vm0, 0.0, %v1404_v5 }
 0x3c9   :  { %v1412_v0 = vperm.slane %v1408_v44, %v3233_v38 }
 0x3cc   :  { %v1369_v20 = vpop.xlane.xlu0 %1368 }
 0x3cd   :  { %vm1405_vm15 = vcmp.gt.f32.partialorder %v1369_v20, 0.5 }
 0x3ce   :  { %v1407_v6 = vsel %vm1405_vm15, 0.0, %v1403_v1 }
 0x3cf   :  { %v1411_v25 = vperm.slane %v1407_v6, %v3233_v38 }
 0x3d1   :  { %v1413_v51 = vsel %vm1350_vm6, %v1412_v0, %v1411_v25 }
 0x3d2   :  { %1416 = vst.msk [vmem:[#allocation8] sm:$0x3] %vm1415_vm9, %v1413_v51 }
 0x3d3   :  { %1427 = dma.vmem_to_hbm [thread:$0]  %s1423_s2, 32, %s1425_s30, [#allocation4]  }
 0x3d4   :  { %1593 = dma.done.wait [#allocation4], 32  }
 0x3d5   :  { %1594 = vsyncadd [#allocation4], 4294967264 }
 0x3d6   :  { %1432 = vsyncpa [#allocation3], 1 }
 0x3d7   :  { %1433 = vsyncpa [#allocation6], 1 }
 0x3d8   :  { %1434 = vsyncpa [#allocation4], 1 }

</bundles_post_ra>
